<compile_context>
chip_gen: v7x
topology: tpu7x:2x2x1
jax: 0.10.0
libtpu: 0.0.40
codegen_flags: <defaults>
</compile_context>

<pallas_src>
import jax
import jax.numpy as jnp
from jax.experimental import pallas as pl
from jax.experimental.pallas import tpu as pltpu

EPS = 1e-5
NEG = -1e30      # bias for padded class lanes -> exp() underflows to exactly 0
LANE = 128


def _round_up(x, m):
    return (x + m - 1) // m * m


def _mlp_branch(x, bn_ref, w_ref, lin_b, post_g, post_b, inv_n):
    """BatchNorm1d(train) -> Linear -> ReLU -> BatchNorm1d(train).

    The input BatchNorm is folded into the linear layer (scale onto the weight,
    shift onto the bias); batch stats use the one-pass E[x^2] - E[x]^2 form.
    """
    # ---- input-BN batch statistics (one pass over x) ----
    sx = jnp.sum(x, axis=0, keepdims=True)
    sxx = jnp.sum(x * x, axis=0, keepdims=True)
    mean = sx * inv_n
    var = sxx * inv_n - mean * mean                       # biased, training mode
    gamma = bn_ref[0:1, :]
    beta = bn_ref[1:2, :]
    s = gamma * jax.lax.rsqrt(var + EPS)                  # (1, F)
    t = beta - mean * s                                   # (1, F)

    # ---- fold BN into the linear layer ----
    w = w_ref[...]                                        # (E, F), PyTorch (out, in)
    w_eff_t = (w * s).T                                   # lane-broadcast scale, aligned transpose -> (F, E)
    b_eff = jnp.dot(t, w.T, preferred_element_type=jnp.float32) + lin_b   # (1, E)

    h = jnp.dot(x, w_eff_t, preferred_element_type=jnp.float32) + b_eff   # (N, E)
    h = jnp.maximum(h, 0.0)

    # ---- post-ReLU BatchNorm over E lanes (small tile, normalize in place) ----
    sh = jnp.sum(h, axis=0, keepdims=True)
    shh = jnp.sum(h * h, axis=0, keepdims=True)
    m2 = sh * inv_n
    v2 = shh * inv_n - m2 * m2
    s2 = post_g * jax.lax.rsqrt(v2 + EPS)
    return h * s2 + (post_b - m2 * s2)


def combined_gat_kernel(xh_ref, xl_ref, bnh_ref, bnl_ref, wh_ref, wl_ref,
                        vec_ref, wc_ref, bc_ref, out_ref):
    inv_n = 1.0 / xh_ref.shape[0]
    emb = vec_ref.shape[1]

    vec = vec_ref[...]                                    # (8, E) packed small vectors
    bh, mh_g, mh_b = vec[0:1], vec[1:2], vec[2:3]
    bl, ml_g, ml_b = vec[3:4], vec[4:5], vec[5:6]

    h = _mlp_branch(xh_ref[...], bnh_ref, wh_ref, bh, mh_g, mh_b, inv_n)   # (N, E)
    l = _mlp_branch(xl_ref[...], bnl_ref, wl_ref, bl, ml_g, ml_b, inv_n)   # (N, E)

    # classifier on cat([h, l], -1): split the (2E, O) weight rows instead of a
    # lane-axis concat.
    wc = wc_ref[...]
    logits = (jnp.dot(h, wc[:emb], preferred_element_type=jnp.float32)
              + jnp.dot(l, wc[emb:], preferred_element_type=jnp.float32)
              + bc_ref[...])                                              # (N, 128)

    # log(softmax(logits, dim=1)); padded class lanes carry a -1e30 bias so
    # they drop out of the reduction while the store stays 128-lane dense.
    m = jnp.max(logits, axis=1, keepdims=True)
    z = logits - m
    lse = jnp.log(jnp.sum(jnp.exp(z), axis=1, keepdims=True))
    out_ref[...] = z - lse


def combined_gat_forward(high, low, edge_index, packed):
    """Forward pass; edge_index accepted but unused (as in the PyTorch module)."""
    del edge_index
    n = high.shape[0]
    f_hi = packed["bn_h"].shape[1]
    f_lo = packed["bn_l"].shape[1]
    o_pad = packed["wc"].shape[1]
    out_dim = packed["out_dim"]

    # Zero-pad feature axes to lane multiples (layout plumbing only).
    xh = jnp.pad(high.astype(jnp.float32), ((0, 0), (0, f_hi - high.shape[1])))
    xl = jnp.pad(low.astype(jnp.float32), ((0, 0), (0, f_lo - low.shape[1])))

    args = (xh, xl, packed["bn_h"], packed["bn_l"], packed["w_h"], packed["w_l"],
            packed["vec"], packed["wc"], packed["bc"])
    vmem = pl.BlockSpec(memory_space=pltpu.MemorySpace.VMEM)
    out = pl.pallas_call(
        combined_gat_kernel,
        out_shape=jax.ShapeDtypeStruct((n, o_pad), jnp.float32),
        in_specs=[vmem] * len(args),
        out_specs=vmem,
    )(*args)
    return out[:, :out_dim]


def init_params(key, high_dim=498, low_dim=17, emb=32, out_dim=8):
    """Logical (unpadded) parameters; Linear weights kept in PyTorch (out, in) layout."""
    ks = jax.random.split(key, 12)
    p = {
        # BatchNorm affine params (randomized so the test exercises them).
        "bnh_g": 1.0 + 0.1 * jax.random.normal(ks[0], (high_dim,), jnp.float32),
        "bnh_b": 0.1 * jax.random.normal(ks[1], (high_dim,), jnp.float32),
        "bnl_g": 1.0 + 0.1 * jax.random.normal(ks[2], (low_dim,), jnp.float32),
        "bnl_b": 0.1 * jax.random.normal(ks[3], (low_dim,), jnp.float32),
        "mh_g": 1.0 + 0.1 * jax.random.normal(ks[4], (emb,), jnp.float32),
        "mh_b": 0.1 * jax.random.normal(ks[5], (emb,), jnp.float32),
        "ml_g": 1.0 + 0.1 * jax.random.normal(ks[6], (emb,), jnp.float32),
        "ml_b": 0.1 * jax.random.normal(ks[7], (emb,), jnp.float32),
        # Linear weights / biases.
        "wh": 0.05 * jax.random.normal(ks[8], (emb, high_dim), jnp.float32),
        "bh": 0.05 * jax.random.normal(ks[9], (emb,), jnp.float32),
        "wl": 0.05 * jax.random.normal(ks[10], (emb, low_dim), jnp.float32),
        "bl": 0.05 * jax.random.normal(ks[11], (emb,), jnp.float32),
        "wc": 0.05 * jax.random.normal(ks[0], (out_dim, 2 * emb), jnp.float32),
        "bc": 0.05 * jax.random.normal(ks[1], (out_dim,), jnp.float32),
    }
    return p


def pack_params(p, emb=32, out_dim=8):
    """Pad/pack logical params into the few lane-aligned arrays the kernel reads (one-time)."""
    f_hi = _round_up(p["wh"].shape[1], LANE)          # 498 -> 512
    f_lo = _round_up(p["wl"].shape[1], LANE)          # 17  -> 128
    o_pad = _round_up(out_dim, LANE)                  # 8   -> 128

    def pad_last(a, n):
        return jnp.pad(a, [(0, 0)] * (a.ndim - 1) + [(0, n - a.shape[-1])])

    zeros_e = jnp.zeros((emb,), jnp.float32)
    packed = {
        "bn_h": jnp.stack([pad_last(p["bnh_g"], f_hi), pad_last(p["bnh_b"], f_hi)]),  # (2, 512)
        "bn_l": jnp.stack([pad_last(p["bnl_g"], f_lo), pad_last(p["bnl_b"], f_lo)]),  # (2, 128)
        "w_h": pad_last(p["wh"], f_hi),                                               # (E, 512)
        "w_l": pad_last(p["wl"], f_lo),                                               # (E, 128)
        "vec": jnp.stack([p["bh"], p["mh_g"], p["mh_b"],
                          p["bl"], p["ml_g"], p["ml_b"], zeros_e, zeros_e]),          # (8, E)
        "wc": jnp.pad(p["wc"].T, ((0, 0), (0, o_pad - out_dim))),                     # (2E, 128)
        "bc": jnp.pad(p["bc"], (0, o_pad - out_dim), constant_values=NEG)[None, :],   # (1, 128)
        "out_dim": out_dim,
    }
    return packed


def _bn_ref(x, gamma, beta):
    mean = jnp.mean(x, axis=0, keepdims=True)
    var = jnp.mean((x - mean) ** 2, axis=0, keepdims=True)   # biased, training mode
    return (x - mean) * jax.lax.rsqrt(var + EPS) * gamma + beta


def reference_forward(high, low, p):
    """Pure-JAX mirror of the PyTorch forward (module in training mode)."""
    h = _bn_ref(high, p["bnh_g"], p["bnh_b"])
    h = jnp.maximum(h @ p["wh"].T + p["bh"], 0.0)
    h = _bn_ref(h, p["mh_g"], p["mh_b"])
    l = _bn_ref(low, p["bnl_g"], p["bnl_b"])
    l = jnp.maximum(l @ p["wl"].T + p["bl"], 0.0)
    l = _bn_ref(l, p["ml_g"], p["ml_b"])
    combined = jnp.concatenate([h, l], axis=-1)
    logits = combined @ p["wc"].T + p["bc"]
    return jnp.log(jax.nn.softmax(logits, axis=1))


if __name__ == "__main__":
    key = jax.random.PRNGKey(0)
    k_high, k_low, k_param = jax.random.split(key, 3)

    N = 128                      # batch rows: fills a 128x128 MXU pass, amortizes call overhead
    HIGH_DIM, LOW_DIM = 498, 17  # fixed by BatchNorm1d(498) / BatchNorm1d(17) in the module
    EMB, OUT = 32, 8

    high = jax.random.normal(k_high, (N, HIGH_DIM), jnp.float32)
    low = jax.random.normal(k_low, (N, LOW_DIM), jnp.float32)
    edge_index = jnp.zeros((2, 16), jnp.int32)   # accepted but unused, as in PyTorch

    params = init_params(k_param, HIGH_DIM, LOW_DIM, EMB, OUT)
    packed = pack_params(params, EMB, OUT)

    out = combined_gat_forward(high, low, edge_index, packed)
    jax.block_until_ready(out)

    ref = reference_forward(high, low, params)
    assert out.shape == (N, OUT)
    assert jnp.allclose(out, ref, atol=1e-4, rtol=1e-4), "Pallas output mismatch vs JAX reference"

    print("KERNEL_OK")
</pallas_src>

<mosaic_0001>
module attributes {stable_mosaic.version = 11 : i64} {
  func.func @combined_gat_kernel(%arg0: memref<128x512xf32, #tpu.memory_space<vmem>>, %arg1: memref<128x128xf32, #tpu.memory_space<vmem>>, %arg2: memref<2x512xf32, #tpu.memory_space<vmem>>, %arg3: memref<2x128xf32, #tpu.memory_space<vmem>>, %arg4: memref<32x512xf32, #tpu.memory_space<vmem>>, %arg5: memref<32x128xf32, #tpu.memory_space<vmem>>, %arg6: memref<8x32xf32, #tpu.memory_space<vmem>>, %arg7: memref<64x128xf32, #tpu.memory_space<vmem>>, %arg8: memref<1x128xf32, #tpu.memory_space<vmem>>, %arg9: memref<128x128xf32, #tpu.memory_space<vmem>>) attributes {dimension_semantics = [], scalar_prefetch = 0 : i64, scratch_operands = 0 : i64, tpu.core_type = #tpu.core_type<tc>} {
    %c0 = arith.constant 0 : index
    %c0_0 = arith.constant 0 : index
    %0 = vector.load %arg6[%c0, %c0_0] : memref<8x32xf32, #tpu.memory_space<vmem>>, vector<8x32xf32>
    %1 = vector.extract_strided_slice %0 {offsets = [0, 0], sizes = [1, 32], strides = [1, 1]} : vector<8x32xf32> to vector<1x32xf32>
    %2 = vector.extract_strided_slice %0 {offsets = [1, 0], sizes = [1, 32], strides = [1, 1]} : vector<8x32xf32> to vector<1x32xf32>
    %3 = vector.extract_strided_slice %0 {offsets = [2, 0], sizes = [1, 32], strides = [1, 1]} : vector<8x32xf32> to vector<1x32xf32>
    %4 = vector.extract_strided_slice %0 {offsets = [3, 0], sizes = [1, 32], strides = [1, 1]} : vector<8x32xf32> to vector<1x32xf32>
    %5 = vector.extract_strided_slice %0 {offsets = [4, 0], sizes = [1, 32], strides = [1, 1]} : vector<8x32xf32> to vector<1x32xf32>
    %6 = vector.extract_strided_slice %0 {offsets = [5, 0], sizes = [1, 32], strides = [1, 1]} : vector<8x32xf32> to vector<1x32xf32>
    %c0_1 = arith.constant 0 : index
    %c0_2 = arith.constant 0 : index
    %7 = vector.load %arg0[%c0_1, %c0_2] : memref<128x512xf32, #tpu.memory_space<vmem>>, vector<128x512xf32>
    %cst = arith.constant dense<0.000000e+00> : vector<512xf32>
    %8 = vector.multi_reduction <add>, %7, %cst [0] : vector<128x512xf32> to vector<512xf32>
    %9 = vector.shape_cast %8 : vector<512xf32> to vector<1x512xf32>
    %10 = arith.mulf %7, %7 : vector<128x512xf32>
    %cst_3 = arith.constant dense<0.000000e+00> : vector<512xf32>
    %11 = vector.multi_reduction <add>, %10, %cst_3 [0] : vector<128x512xf32> to vector<512xf32>
    %12 = vector.shape_cast %11 : vector<512xf32> to vector<1x512xf32>
    %cst_4 = arith.constant 7.812500e-03 : f32
    %13 = vector.broadcast %cst_4 : f32 to vector<1x512xf32>
    %14 = arith.mulf %9, %13 : vector<1x512xf32>
    %cst_5 = arith.constant 7.812500e-03 : f32
    %15 = vector.broadcast %cst_5 : f32 to vector<1x512xf32>
    %16 = arith.mulf %12, %15 : vector<1x512xf32>
    %17 = arith.mulf %14, %14 : vector<1x512xf32>
    %18 = arith.subf %16, %17 : vector<1x512xf32>
    %c0_6 = arith.constant 0 : index
    %c0_7 = arith.constant 0 : index
    %19 = vector.load %arg2[%c0_6, %c0_7] : memref<2x512xf32, #tpu.memory_space<vmem>>, vector<1x512xf32>
    %c1 = arith.constant 1 : index
    %c0_8 = arith.constant 0 : index
    %20 = vector.load %arg2[%c1, %c0_8] : memref<2x512xf32, #tpu.memory_space<vmem>>, vector<1x512xf32>
    %cst_9 = arith.constant 9.99999974E-6 : f32
    %21 = vector.broadcast %cst_9 : f32 to vector<1x512xf32>
    %22 = arith.addf %18, %21 : vector<1x512xf32>
    %23 = math.rsqrt %22 : vector<1x512xf32>
    %24 = arith.mulf %19, %23 : vector<1x512xf32>
    %25 = arith.mulf %14, %24 : vector<1x512xf32>
    %26 = arith.subf %20, %25 : vector<1x512xf32>
    %c0_10 = arith.constant 0 : index
    %c0_11 = arith.constant 0 : index
    %27 = vector.load %arg4[%c0_10, %c0_11] : memref<32x512xf32, #tpu.memory_space<vmem>>, vector<32x512xf32>
    %28 = vector.broadcast %24 : vector<1x512xf32> to vector<32x512xf32>
    %29 = arith.mulf %27, %28 : vector<32x512xf32>
    %30 = tpu.transpose %29, [1, 0] : vector<32x512xf32> -> vector<512x32xf32>
    %31 = tpu.transpose %27, [1, 0] : vector<32x512xf32> -> vector<512x32xf32>
    %cst_12 = arith.constant dense<0.000000e+00> : vector<1x32xf32>
    %32 = tpu.matmul %26, %31, %cst_12 {dimension_numbers = #tpu.dot_dimension_numbers<[1], [0], [0], [1], [0, 0, 1, 1], [], []>} : vector<1x512xf32>, vector<512x32xf32>, vector<1x32xf32> -> vector<1x32xf32>
    %33 = arith.addf %32, %1 : vector<1x32xf32>
    %cst_13 = arith.constant dense<0.000000e+00> : vector<128x32xf32>
    %34 = tpu.matmul %7, %30, %cst_13 {dimension_numbers = #tpu.dot_dimension_numbers<[1], [0], [0], [1], [0, 0, 1, 1], [], []>} : vector<128x512xf32>, vector<512x32xf32>, vector<128x32xf32> -> vector<128x32xf32>
    %35 = vector.broadcast %33 : vector<1x32xf32> to vector<128x32xf32>
    %36 = arith.addf %34, %35 : vector<128x32xf32>
    %cst_14 = arith.constant 0.000000e+00 : f32
    %37 = vector.broadcast %cst_14 : f32 to vector<128x32xf32>
    %38 = arith.maximumf %36, %37 : vector<128x32xf32>
    %cst_15 = arith.constant dense<0.000000e+00> : vector<32xf32>
    %39 = vector.multi_reduction <add>, %38, %cst_15 [0] : vector<128x32xf32> to vector<32xf32>
    %40 = vector.shape_cast %39 : vector<32xf32> to vector<1x32xf32>
    %41 = arith.mulf %38, %38 : vector<128x32xf32>
    %cst_16 = arith.constant dense<0.000000e+00> : vector<32xf32>
    %42 = vector.multi_reduction <add>, %41, %cst_16 [0] : vector<128x32xf32> to vector<32xf32>
    %43 = vector.shape_cast %42 : vector<32xf32> to vector<1x32xf32>
    %cst_17 = arith.constant 7.812500e-03 : f32
    %44 = vector.broadcast %cst_17 : f32 to vector<1x32xf32>
    %45 = arith.mulf %40, %44 : vector<1x32xf32>
    %cst_18 = arith.constant 7.812500e-03 : f32
    %46 = vector.broadcast %cst_18 : f32 to vector<1x32xf32>
    %47 = arith.mulf %43, %46 : vector<1x32xf32>
    %48 = arith.mulf %45, %45 : vector<1x32xf32>
    %49 = arith.subf %47, %48 : vector<1x32xf32>
    %cst_19 = arith.constant 9.99999974E-6 : f32
    %50 = vector.broadcast %cst_19 : f32 to vector<1x32xf32>
    %51 = arith.addf %49, %50 : vector<1x32xf32>
    %52 = math.rsqrt %51 : vector<1x32xf32>
    %53 = arith.mulf %2, %52 : vector<1x32xf32>
    %54 = vector.broadcast %53 : vector<1x32xf32> to vector<128x32xf32>
    %55 = arith.mulf %38, %54 : vector<128x32xf32>
    %56 = arith.mulf %45, %53 : vector<1x32xf32>
    %57 = arith.subf %3, %56 : vector<1x32xf32>
    %58 = vector.broadcast %57 : vector<1x32xf32> to vector<128x32xf32>
    %59 = arith.addf %55, %58 : vector<128x32xf32>
    %c0_20 = arith.constant 0 : index
    %c0_21 = arith.constant 0 : index
    %60 = vector.load %arg1[%c0_20, %c0_21] : memref<128x128xf32, #tpu.memory_space<vmem>>, vector<128x128xf32>
    %cst_22 = arith.constant dense<0.000000e+00> : vector<128xf32>
    %61 = vector.multi_reduction <add>, %60, %cst_22 [0] : vector<128x128xf32> to vector<128xf32>
    %62 = vector.shape_cast %61 : vector<128xf32> to vector<1x128xf32>
    %63 = arith.mulf %60, %60 : vector<128x128xf32>
    %cst_23 = arith.constant dense<0.000000e+00> : vector<128xf32>
    %64 = vector.multi_reduction <add>, %63, %cst_23 [0] : vector<128x128xf32> to vector<128xf32>
    %65 = vector.shape_cast %64 : vector<128xf32> to vector<1x128xf32>
    %cst_24 = arith.constant 7.812500e-03 : f32
    %66 = vector.broadcast %cst_24 : f32 to vector<1x128xf32>
    %67 = arith.mulf %62, %66 : vector<1x128xf32>
    %cst_25 = arith.constant 7.812500e-03 : f32
    %68 = vector.broadcast %cst_25 : f32 to vector<1x128xf32>
    %69 = arith.mulf %65, %68 : vector<1x128xf32>
    %70 = arith.mulf %67, %67 : vector<1x128xf32>
    %71 = arith.subf %69, %70 : vector<1x128xf32>
    %c0_26 = arith.constant 0 : index
    %c0_27 = arith.constant 0 : index
    %72 = vector.load %arg3[%c0_26, %c0_27] : memref<2x128xf32, #tpu.memory_space<vmem>>, vector<1x128xf32>
    %c1_28 = arith.constant 1 : index
    %c0_29 = arith.constant 0 : index
    %73 = vector.load %arg3[%c1_28, %c0_29] : memref<2x128xf32, #tpu.memory_space<vmem>>, vector<1x128xf32>
    %cst_30 = arith.constant 9.99999974E-6 : f32
    %74 = vector.broadcast %cst_30 : f32 to vector<1x128xf32>
    %75 = arith.addf %71, %74 : vector<1x128xf32>
    %76 = math.rsqrt %75 : vector<1x128xf32>
    %77 = arith.mulf %72, %76 : vector<1x128xf32>
    %78 = arith.mulf %67, %77 : vector<1x128xf32>
    %79 = arith.subf %73, %78 : vector<1x128xf32>
    %c0_31 = arith.constant 0 : index
    %c0_32 = arith.constant 0 : index
    %80 = vector.load %arg5[%c0_31, %c0_32] : memref<32x128xf32, #tpu.memory_space<vmem>>, vector<32x128xf32>
    %81 = vector.broadcast %77 : vector<1x128xf32> to vector<32x128xf32>
    %82 = arith.mulf %80, %81 : vector<32x128xf32>
    %83 = tpu.transpose %82, [1, 0] : vector<32x128xf32> -> vector<128x32xf32>
    %84 = tpu.transpose %80, [1, 0] : vector<32x128xf32> -> vector<128x32xf32>
    %cst_33 = arith.constant dense<0.000000e+00> : vector<1x32xf32>
    %85 = tpu.matmul %79, %84, %cst_33 {dimension_numbers = #tpu.dot_dimension_numbers<[1], [0], [0], [1], [0, 0, 1, 1], [], []>} : vector<1x128xf32>, vector<128x32xf32>, vector<1x32xf32> -> vector<1x32xf32>
    %86 = arith.addf %85, %4 : vector<1x32xf32>
    %cst_34 = arith.constant dense<0.000000e+00> : vector<128x32xf32>
    %87 = tpu.matmul %60, %83, %cst_34 {dimension_numbers = #tpu.dot_dimension_numbers<[1], [0], [0], [1], [0, 0, 1, 1], [], []>} : vector<128x128xf32>, vector<128x32xf32>, vector<128x32xf32> -> vector<128x32xf32>
    %88 = vector.broadcast %86 : vector<1x32xf32> to vector<128x32xf32>
    %89 = arith.addf %87, %88 : vector<128x32xf32>
    %cst_35 = arith.constant 0.000000e+00 : f32
    %90 = vector.broadcast %cst_35 : f32 to vector<128x32xf32>
    %91 = arith.maximumf %89, %90 : vector<128x32xf32>
    %cst_36 = arith.constant dense<0.000000e+00> : vector<32xf32>
    %92 = vector.multi_reduction <add>, %91, %cst_36 [0] : vector<128x32xf32> to vector<32xf32>
    %93 = vector.shape_cast %92 : vector<32xf32> to vector<1x32xf32>
    %94 = arith.mulf %91, %91 : vector<128x32xf32>
    %cst_37 = arith.constant dense<0.000000e+00> : vector<32xf32>
    %95 = vector.multi_reduction <add>, %94, %cst_37 [0] : vector<128x32xf32> to vector<32xf32>
    %96 = vector.shape_cast %95 : vector<32xf32> to vector<1x32xf32>
    %cst_38 = arith.constant 7.812500e-03 : f32
    %97 = vector.broadcast %cst_38 : f32 to vector<1x32xf32>
    %98 = arith.mulf %93, %97 : vector<1x32xf32>
    %cst_39 = arith.constant 7.812500e-03 : f32
    %99 = vector.broadcast %cst_39 : f32 to vector<1x32xf32>
    %100 = arith.mulf %96, %99 : vector<1x32xf32>
    %101 = arith.mulf %98, %98 : vector<1x32xf32>
    %102 = arith.subf %100, %101 : vector<1x32xf32>
    %cst_40 = arith.constant 9.99999974E-6 : f32
    %103 = vector.broadcast %cst_40 : f32 to vector<1x32xf32>
    %104 = arith.addf %102, %103 : vector<1x32xf32>
    %105 = math.rsqrt %104 : vector<1x32xf32>
    %106 = arith.mulf %5, %105 : vector<1x32xf32>
    %107 = vector.broadcast %106 : vector<1x32xf32> to vector<128x32xf32>
    %108 = arith.mulf %91, %107 : vector<128x32xf32>
    %109 = arith.mulf %98, %106 : vector<1x32xf32>
    %110 = arith.subf %6, %109 : vector<1x32xf32>
    %111 = vector.broadcast %110 : vector<1x32xf32> to vector<128x32xf32>
    %112 = arith.addf %108, %111 : vector<128x32xf32>
    %c0_41 = arith.constant 0 : index
    %c0_42 = arith.constant 0 : index
    %113 = vector.load %arg7[%c0_41, %c0_42] : memref<64x128xf32, #tpu.memory_space<vmem>>, vector<64x128xf32>
    %114 = vector.extract_strided_slice %113 {offsets = [0, 0], sizes = [32, 128], strides = [1, 1]} : vector<64x128xf32> to vector<32x128xf32>
    %cst_43 = arith.constant dense<0.000000e+00> : vector<128x128xf32>
    %115 = tpu.matmul %59, %114, %cst_43 {dimension_numbers = #tpu.dot_dimension_numbers<[1], [0], [0], [1], [0, 0, 1, 1], [], []>} : vector<128x32xf32>, vector<32x128xf32>, vector<128x128xf32> -> vector<128x128xf32>
    %116 = vector.extract_strided_slice %113 {offsets = [32, 0], sizes = [32, 128], strides = [1, 1]} : vector<64x128xf32> to vector<32x128xf32>
    %cst_44 = arith.constant dense<0.000000e+00> : vector<128x128xf32>
    %117 = tpu.matmul %112, %116, %cst_44 {dimension_numbers = #tpu.dot_dimension_numbers<[1], [0], [0], [1], [0, 0, 1, 1], [], []>} : vector<128x32xf32>, vector<32x128xf32>, vector<128x128xf32> -> vector<128x128xf32>
    %118 = arith.addf %115, %117 : vector<128x128xf32>
    %c0_45 = arith.constant 0 : index
    %c0_46 = arith.constant 0 : index
    %119 = vector.load %arg8[%c0_45, %c0_46] : memref<1x128xf32, #tpu.memory_space<vmem>>, vector<1x128xf32>
    %120 = vector.broadcast %119 : vector<1x128xf32> to vector<128x128xf32>
    %121 = arith.addf %118, %120 : vector<128x128xf32>
    %cst_47 = arith.constant dense<0xFF800000> : vector<128xf32>
    %122 = vector.multi_reduction <maximumf>, %121, %cst_47 [1] : vector<128x128xf32> to vector<128xf32>
    %123 = vector.shape_cast %122 : vector<128xf32> to vector<128x1xf32>
    %124 = vector.broadcast %123 : vector<128x1xf32> to vector<128x128xf32>
    %125 = arith.subf %121, %124 : vector<128x128xf32>
    %126 = math.exp %125 : vector<128x128xf32>
    %cst_48 = arith.constant dense<0.000000e+00> : vector<128xf32>
    %127 = vector.multi_reduction <add>, %126, %cst_48 [1] : vector<128x128xf32> to vector<128xf32>
    %128 = vector.shape_cast %127 : vector<128xf32> to vector<128x1xf32>
    %129 = math.log %128 : vector<128x1xf32>
    %130 = vector.broadcast %129 : vector<128x1xf32> to vector<128x128xf32>
    %131 = arith.subf %125, %130 : vector<128x128xf32>
    %c0_49 = arith.constant 0 : index
    %c0_50 = arith.constant 0 : index
    %132 = vector.load %arg9[%c0_49, %c0_50] : memref<128x128xf32, #tpu.memory_space<vmem>>, vector<128x128xf32>
    tpu.vector_store %arg9[%c0_49, %c0_50], %131 {strides = array<i32>} : memref<128x128xf32, #tpu.memory_space<vmem>>, vector<128x128xf32>,
    return
  }
}

</mosaic_0001>

<bundles_post_ra>
// kernel: tpu_custom_call.1
= control target key start
LH: loop header
LB: loop body
LE: loop exit
PB: predicated region body
PF: predicated region fallthrough
CT: control target
= control target key end

     0   :  { %14 = vsyncpa [#allocation3], 0  ;;  %s4303_s0 = inlined_call_operand.hbm [shape: f32[128,512], index: 0, kind: input, shape index: {}]   ;;  %s4304_s1 = inlined_call_operand.hbm [shape: f32[128,128], index: 1, kind: input, shape index: {}]   ;;  %s4305_s2 = inlined_call_operand.hbm [shape: f32[2,512], index: 2, kind: input, shape index: {}]   ;;  %s4306_s3 = inlined_call_operand.vmem [shape: f32[2,128], index: 3, kind: input, shape index: {}]   ;;  %s4307_s4 = inlined_call_operand.hbm [shape: f32[32,512], index: 4, kind: input, shape index: {}]   ;;  %s4308_s5 = inlined_call_operand.hbm [shape: f32[32,128], index: 5, kind: input, shape index: {}]   ;;  %s4309_s6 = inlined_call_operand.vmem [shape: f32[8,32], index: 6, kind: input, shape index: {}]   ;;  %s4310_s7 = inlined_call_operand.hbm [shape: f32[64,128], index: 7, kind: input, shape index: {}]   ;;  %s4311_s8 = inlined_call_operand.vmem [shape: f32[1,128], index: 8, kind: input, shape index: {}]   ;;  %s4312_s9 = inlined_call_operand.hbm [shape: f32[128,128], index: 9, kind: output, shape index: {}]  }
   0x1   :  { %15 = vsyncpa [#allocation6], 0 }
   0x2   :  { %16 = vsyncpa [#allocation9], 0 }
   0x3   :  { %17 = vsyncpa [#allocation12], 0 }
   0x4   :  { %18 = vsyncpa [#allocation4], 0  ;;  %s2874_s30 = smov [#allocation5]   ;;  %s2710_s13 = scalar_lea.hbm %s4304_s1, 2048 }
   0x5   :  { %s36_s10 = sshll.u32 %s2874_s30, 4  ;;  %p2711_p0 = scmp.ne.s32.totalorder %s4304_s1, %s2710_s13  ;;  %s37_s10 = int_to_ptr.vmem [resolvable:$true] %s36_s10 }
   0x6   :  { %p2714_p1 = scmp.lt.u32.totalorder %s2710_s13, %s4304_s1 }
   0x8   :  { %p2716_p2 = pnand %p2714_p1, %p2711_p0 }
   0xa   :  { %2719 = shalt.err (!%p2716_p2)
}
   0xb   :  { %s2720_s18 = scalar_lea.vmem %s37_s10, 2048  ;;  %p2725_p4 = scmp.lt.s32.totalorder %s37_s10, %s37_s10 }
   0xc   :  { %p2721_p3 = scmp.ne.s32.totalorder %s37_s10, %s2720_s18  ;;  %p2726_p5 = scmp.lt.s32.totalorder %s2720_s18, %s2720_s18 }
   0xe   :  { %p2727_p6 = por %p2726_p5, %p2725_p4 }
  0x10   :  { %p2728_p7 = pnand %p2727_p6, %p2721_p3 }
  0x12   :  { %2731 = shalt.err (!%p2728_p7)
}
  0x13   :  { %s2875_s19 = smov 128   ;;  %s2876_s20 = smov 8  }
  0x14   :  { %42 = dma.hbm_to_vmem [thread:$0]  %s4304_s1, 2048, %s37_s10, [#allocation6], %s2875_s19, %s2875_s19, %s2876_s20  }
  0x15   :  { %s2877_s23 = smov [#allocation8]   ;;  %s2878_s25 = smov [#allocation2]  }
  0x16   :  { %s60_s24 = sshll.u32 %s2877_s23, 4  ;;  %s24_s26 = sshll.u32 %s2878_s25, 4  ;;  %s61_s24 = int_to_ptr.vmem [resolvable:$true] %s60_s24  ;;  %s25_s26 = int_to_ptr.vmem [resolvable:$true] %s24_s26 }
  0x17   :  { %s2732_s29 = scalar_lea.hbm %s4307_s4, 2048 }
  0x18   :  { %p2733_p8 = scmp.ne.s32.totalorder %s4307_s4, %s2732_s29  ;;  %p2736_p9 = scmp.lt.u32.totalorder %s2732_s29, %s4307_s4 }
  0x1a   :  { %p2738_p10 = pnand %p2736_p9, %p2733_p8 }
  0x1c   :  { %2741 = shalt.err (!%p2738_p10)
}
  0x1d   :  { %s2742_s1 = scalar_lea.vmem %s61_s24, 2048  ;;  %p2747_p12 = scmp.lt.s32.totalorder %s61_s24, %s61_s24 }
  0x1e   :  { %p2743_p11 = scmp.ne.s32.totalorder %s61_s24, %s2742_s1  ;;  %p2748_p13 = scmp.lt.s32.totalorder %s2742_s1, %s2742_s1 }
  0x20   :  { %p2749_p0 = por %p2748_p13, %p2747_p12 }
  0x22   :  { %p2750_p1 = pnand %p2749_p0, %p2743_p11 }
  0x24   :  { %2753 = shalt.err (!%p2750_p1)
}
  0x25   :  { %s2879_s10 = smov 512   ;;  %s2880_s14 = smov 32  }
  0x26   :  { %66 = dma.hbm_to_vmem [thread:$0]  %s4307_s4, 2048, %s61_s24, [#allocation9], %s2879_s10, %s2879_s10, %s2880_s14  }
  0x27   :  { %s2754_s21 = scalar_lea.hbm %s4303_s0, 8192 }
  0x28   :  { %p2755_p2 = scmp.ne.s32.totalorder %s4303_s0, %s2754_s21  ;;  %p2758_p3 = scmp.lt.u32.totalorder %s2754_s21, %s4303_s0 }
  0x2a   :  { %p2760_p4 = pnand %p2758_p3, %p2755_p2 }
  0x2c   :  { %2763 = shalt.err (!%p2760_p4)
}
  0x2d   :  { %s2764_s28 = scalar_lea.vmem %s25_s26, 8192  ;;  %p2769_p6 = scmp.lt.s32.totalorder %s25_s26, %s25_s26 }
  0x2e   :  { %p2765_p5 = scmp.ne.s32.totalorder %s25_s26, %s2764_s28  ;;  %p2770_p7 = scmp.lt.s32.totalorder %s2764_s28, %s2764_s28 }
  0x30   :  { %p2771_p8 = por %p2770_p7, %p2769_p6 }
  0x32   :  { %p2772_p9 = pnand %p2771_p8, %p2765_p5 }
  0x34   :  { %2775 = shalt.err (!%p2772_p9)
}
  0x35   :  { %30 = dma.hbm_to_vmem [thread:$0]  %s4303_s0, 8192, %s25_s26, [#allocation3], %s2879_s10, %s2879_s10, %s2880_s14  }
  0x36   :  { %s2881_s29 = smov [#allocation7]   ;;  %s2882_s11 = smov [#allocation10]  }
  0x37   :  { %s49_s30 = sshll.u32 %s2881_s29, 4  ;;  %s72_s12 = sshll.u32 %s2882_s11, 4  ;;  %s50_s30 = int_to_ptr.vmem [resolvable:$true] %s49_s30  ;;  %s73_s12 = int_to_ptr.vmem [resolvable:$true] %s72_s12 }
  0x38   :  { %s2776_s15 = scalar_lea.hbm %s4305_s2, 128 }
  0x39   :  { %p2777_p10 = scmp.ne.s32.totalorder %s4305_s2, %s2776_s15  ;;  %p2780_p11 = scmp.lt.u32.totalorder %s2776_s15, %s4305_s2 }
  0x3b   :  { %p2782_p12 = pnand %p2780_p11, %p2777_p10 }
  0x3d   :  { %2785 = shalt.err (!%p2782_p12)
}
  0x3e   :  { %s2786_s0 = scalar_lea.vmem %s50_s30, 128  ;;  %p2791_p0 = scmp.lt.s32.totalorder %s50_s30, %s50_s30 }
  0x3f   :  { %p2787_p13 = scmp.ne.s32.totalorder %s50_s30, %s2786_s0  ;;  %p2792_p1 = scmp.lt.s32.totalorder %s2786_s0, %s2786_s0 }
  0x41   :  { %p2793_p2 = por %p2792_p1, %p2791_p0 }
  0x43   :  { %p2794_p3 = pnand %p2793_p2, %p2787_p13 }
  0x45   :  { %2797 = shalt.err (!%p2794_p3)
}
  0x46   :  { %52 = dma.hbm_to_vmem [thread:$0]  %s4305_s2, 128, %s50_s30, [#allocation6]  }
  0x47   :  { %s2798_s23 = scalar_lea.hbm %s4308_s5, 512 }
  0x48   :  { %p2799_p4 = scmp.ne.s32.totalorder %s4308_s5, %s2798_s23  ;;  %p2802_p5 = scmp.lt.u32.totalorder %s2798_s23, %s4308_s5 }
  0x4a   :  { %p2804_p6 = pnand %p2802_p5, %p2799_p4 }
  0x4c   :  { %2807 = shalt.err (!%p2804_p6)
}
  0x4d   :  { %s2808_s24 = scalar_lea.vmem %s73_s12, 512  ;;  %p2813_p8 = scmp.lt.s32.totalorder %s73_s12, %s73_s12 }
  0x4e   :  { %p2809_p7 = scmp.ne.s32.totalorder %s73_s12, %s2808_s24  ;;  %p2814_p9 = scmp.lt.s32.totalorder %s2808_s24, %s2808_s24 }
  0x50   :  { %p2815_p10 = por %p2814_p9, %p2813_p8 }
  0x52   :  { %p2816_p11 = pnand %p2815_p10, %p2809_p7 }
  0x54   :  { %2819 = shalt.err (!%p2816_p11)
}
  0x55   :  { %78 = dma.hbm_to_vmem [thread:$0]  %s4308_s5, 512, %s73_s12, [#allocation9], %s2875_s19, %s2875_s19, %s2876_s20  }
  0x56   :  { %s2883_s30 = smov [#allocation11]   ;;  %s2820_s15 = scalar_lea.hbm %s4310_s7, 1024 }
  0x57   :  { %s86_s11 = sshll.u32 %s2883_s30, 4  ;;  %p2821_p12 = scmp.ne.s32.totalorder %s4310_s7, %s2820_s15  ;;  %s87_s11 = int_to_ptr.vmem [resolvable:$true] %s86_s11 }
  0x58   :  { %p2824_p13 = scmp.lt.u32.totalorder %s2820_s15, %s4310_s7 }
  0x5a   :  { %p2826_p0 = pnand %p2824_p13, %p2821_p12 }
  0x5c   :  { %2829 = shalt.err (!%p2826_p0)
}
  0x5d   :  { %s2830_s0 = scalar_lea.vmem %s87_s11, 1024  ;;  %p2835_p2 = scmp.lt.s32.totalorder %s87_s11, %s87_s11 }
  0x5e   :  { %p2831_p1 = scmp.ne.s32.totalorder %s87_s11, %s2830_s0  ;;  %p2836_p3 = scmp.lt.s32.totalorder %s2830_s0, %s2830_s0 }
  0x60   :  { %p2837_p4 = por %p2836_p3, %p2835_p2 }
  0x62   :  { %p2838_p5 = pnand %p2837_p4, %p2831_p1 }
  0x64   :  { %2841 = shalt.err (!%p2838_p5)
}
  0x65   :  { %92 = dma.hbm_to_vmem [thread:$0]  %s4310_s7, 1024, %s87_s11, [#allocation12], %s2875_s19, %s2875_s19, %s2876_s20  }
  0x66   :  { %2864 = dma.done.wait [#allocation3], 8192  }
  0x67   :  { %2865 = vsyncadd [#allocation3], 4294959104 }
  0x68   :  { %2866 = dma.done.wait [#allocation6], 2176  }
  0x69   :  { %2867 = vsyncadd [#allocation6], 4294965120 }
  0x6a   :  { %2868 = dma.done.wait [#allocation9], 2560  }
  0x6b   :  { %2869 = vsyncadd [#allocation9], 4294964736 }
  0x6c   :  { %2870 = dma.done.wait [#allocation12], 1024  }
  0x6d   :  { %2871 = vsyncadd [#allocation12], 4294966272  ;;  %v3020_v0 = vld [vmem:[#allocation2] sm:$0xff]  ;;  %v115_v1 = vld [vmem:[#allocation2 + $0x8] sm:$0xff]  ;;  %vm2886_vm0 = vmmov 0   ;;  %vm1025_vm1 = vcmask 261120  }
  0x6e   :  { %4344 = vst [vmem:[#allocation19_spill] sm:$0xff] %v3020_v0  ;;  %v116_v2 = vld [vmem:[#allocation2 + $0x10] sm:$0xff]  ;;  %v117_v3 = vld [vmem:[#allocation2 + $0x18] sm:$0xff]  ;;  %v3022_v4 = vld [vmem:[#allocation2 + $0x20] sm:$0xff]  ;;  %783 = vmatprep.mubr.f32.mxu1 %v115_v1  ;;  %v3094_v50 = vmul.f32 %v3020_v0, %v3020_v0  ;;  %v3102_v55 = vmul.f32 %v115_v1, %v115_v1 }
  0x6f   :  { %4345 = vst [vmem:[#allocation20_spill] sm:$0xff] %v3022_v4  ;;  %v3024_v5 = vld [vmem:[#allocation2 + $0x28] sm:$0xff]  ;;  %v120_v6 = vld [vmem:[#allocation2 + $0x30] sm:$0xff]  ;;  %v3026_v7 = vld [vmem:[#allocation2 + $0x38] sm:$0xff]  ;;  %v178_v9 = vadd.f32 %v3022_v4, %v3020_v0  ;;  %v3104_v56 = vmul.f32 %v116_v2, %v116_v2  ;;  %v3112_v61 = vmul.f32 %v117_v3, %v117_v3  ;;  %v3116_v62 = vmul.f32 %v3022_v4, %v3022_v4 }
  0x70   :  { %4346 = vst [vmem:[#allocation21_spill] sm:$0xff] %v3024_v5  ;;  %v3028_v8 = vld [vmem:[#allocation2 + $0x40] sm:$0xff]  ;;  %v199_v10 = vadd.f32 %v3024_v5, %v115_v1  ;;  %v3033_v11 = vld [vmem:[#allocation2 + $0x48] sm:$0xff]  ;;  %v3035_v12 = vld [vmem:[#allocation2 + $0x50] sm:$0xff]  ;;  %v220_v14 = vadd.f32 %v120_v6, %v116_v2  ;;  %v241_v15 = vadd.f32 %v3026_v7, %v117_v3 }
  0x71   :  { %4347 = vst [vmem:[#allocation22_spill] sm:$0xff] %v3033_v11  ;;  %v3037_v13 = vld [vmem:[#allocation2 + $0x58] sm:$0xff]  ;;  %v3040_v16 = vld [vmem:[#allocation2 + $0x60] sm:$0xff]  ;;  %v3042_v17 = vld [vmem:[#allocation2 + $0x68] sm:$0xff]  ;;  %v179_v19 = vadd.f32 %v178_v9, %v3028_v8 }
  0x72   :  { %4348 = vst [vmem:[#allocation23_spill] sm:$0xff] %v3042_v17  ;;  %v3044_v18 = vld [vmem:[#allocation2 + $0x70] sm:$0xff]  ;;  %v200_v20 = vadd.f32 %v199_v10, %v3033_v11  ;;  %v3048_v21 = vld [vmem:[#allocation2 + $0x78] sm:$0xff]  ;;  %v3050_v22 = vld [vmem:[#allocation2 + $0x80] sm:$0xff]  ;;  %v221_v24 = vadd.f32 %v220_v14, %v3035_v12  ;;  %v242_v25 = vadd.f32 %v241_v15, %v3037_v13  ;;  %v3126_v10 = vmul.f32 %v3024_v5, %v3024_v5 }
  0x73   :  { %v3052_v23 = vld [vmem:[#allocation2 + $0x88] sm:$0xff]  ;;  %v3056_v26 = vld [vmem:[#allocation2 + $0x90] sm:$0xff]  ;;  %v3058_v27 = vld [vmem:[#allocation2 + $0x98] sm:$0xff]  ;;  %v180_v28 = vadd.f32 %v179_v19, %v3040_v16  ;;  %v3128_v14 = vmul.f32 %v120_v6, %v120_v6 }
  0x74   :  { %4349 = vst [vmem:[#allocation24_spill] sm:$0xff] %v3052_v23  ;;  %v201_v29 = vadd.f32 %v200_v20, %v3042_v17  ;;  %v3062_v30 = vld [vmem:[#allocation2 + $0xa0] sm:$0xff]  ;;  %v3064_v31 = vld [vmem:[#allocation2 + $0xa8] sm:$0xff]  ;;  %v222_v32 = vadd.f32 %v221_v24, %v3044_v18  ;;  %v243_v33 = vadd.f32 %v242_v25, %v3048_v21  ;;  %v3068_v34 = vld [vmem:[#allocation2 + $0xb0] sm:$0xff]  ;;  %v3138_v24 = vmul.f32 %v3026_v7, %v3026_v7 }
  0x75   :  { %4350 = vst [vmem:[#allocation25_spill] sm:$0xff] %v3062_v30  ;;  %4351 = vst [vmem:[#allocation26_spill] sm:$0xff] %v3064_v31  ;;  %v3070_v35 = vld [vmem:[#allocation2 + $0xb8] sm:$0xff]  ;;  %v181_v36 = vadd.f32 %v180_v28, %v3050_v22  ;;  %v3074_v38 = vld [vmem:[#allocation2 + $0xc0] sm:$0xff]  ;;  %v3142_v25 = vmul.f32 %v3028_v8, %v3028_v8  ;;  %v3156_v7 = vmul.f32 %v3035_v12, %v3035_v12 }
  0x76   :  { %v202_v37 = vadd.f32 %v201_v29, %v3052_v23  ;;  %4352 = vst [vmem:[#allocation27_spill] sm:$0xff] %v3074_v38  ;;  %v3076_v39 = vld [vmem:[#allocation2 + $0xc8] sm:$0xff]  ;;  %v223_v40 = vadd.f32 %v222_v32, %v3056_v26  ;;  %v244_v41 = vadd.f32 %v243_v33, %v3058_v27  ;;  %v3080_v42 = vld [vmem:[#allocation2 + $0xd0] sm:$0xff]  ;;  %v3082_v43 = vld [vmem:[#allocation2 + $0xd8] sm:$0xff]  ;;  %v3152_v33 = vmul.f32 %v3033_v11, %v3033_v11 }
  0x77   :  { %4353 = vst [vmem:[#allocation28_spill] sm:$0xff] %v3076_v39  ;;  %v182_v44 = vadd.f32 %v181_v36, %v3062_v30  ;;  %v3086_v46 = vld [vmem:[#allocation2 + $0xe0] sm:$0xff]  ;;  %v3088_v47 = vld [vmem:[#allocation2 + $0xe8] sm:$0xff]  ;;  %v3096_v51 = vld [vmem:[#allocation2 + $0xf0] sm:$0xff] }
  0x78   :  { %v203_v45 = vadd.f32 %v202_v37, %v3064_v31  ;;  %4354 = vst [vmem:[#allocation29_spill] sm:$0xff] %v3086_v46  ;;  %4355 = vst [vmem:[#allocation30_spill] sm:$0xff] %v3088_v47  ;;  %v224_v48 = vadd.f32 %v223_v40, %v3068_v34  ;;  %v245_v49 = vadd.f32 %v244_v41, %v3070_v35  ;;  %v3098_v52 = vld [vmem:[#allocation2 + $0xf8] sm:$0xff]  ;;  %v3106_v57 = vld [vmem:[#allocation2 + $0x100] sm:$0xff] }
  0x79   :  { %v183_v53 = vadd.f32 %v182_v44, %v3074_v38  ;;  %4356 = vst [vmem:[#allocation31_spill] sm:$0xff] %v3106_v57  ;;  %v3108_v58 = vld [vmem:[#allocation2 + $0x108] sm:$0xff]  ;;  %v3118_v63 = vld [vmem:[#allocation2 + $0x110] sm:$0xff]  ;;  %v3120_v1 = vld [vmem:[#allocation2 + $0x118] sm:$0xff]  ;;  %v3166_v41 = vmul.f32 %v3037_v13, %v3037_v13  ;;  %v3170_v44 = vmul.f32 %v3040_v16, %v3040_v16  ;;  %v3184_v13 = vmul.f32 %v3044_v18, %v3044_v18 }
  0x7a   :  { %v204_v54 = vadd.f32 %v203_v45, %v3076_v39  ;;  %4357 = vst [vmem:[#allocation32_spill] sm:$0xff] %v3108_v58  ;;  %v225_v59 = vadd.f32 %v224_v48, %v3080_v42  ;;  %v246_v60 = vadd.f32 %v245_v49, %v3082_v43  ;;  %v3130_v3 = vld [vmem:[#allocation2 + $0x120] sm:$0xff]  ;;  %v3132_v15 = vld [vmem:[#allocation2 + $0x128] sm:$0xff]  ;;  %v3144_v28 = vld [vmem:[#allocation2 + $0x130] sm:$0xff] }
  0x7b   :  { %v184_v2 = vadd.f32 %v183_v53, %v3086_v46  ;;  %4358 = vst [vmem:[#allocation33_spill] sm:$0xff] %v3130_v3  ;;  %4359 = vst [vmem:[#allocation34_spill] sm:$0xff] %v3132_v15  ;;  %v3146_v6 = vld [vmem:[#allocation2 + $0x138] sm:$0xff]  ;;  %v3158_v36 = vld [vmem:[#allocation2 + $0x140] sm:$0xff]  ;;  %v3180_v53 = vmul.f32 %v3042_v17, %v3042_v17 }
  0x7c   :  { %v205_v9 = vadd.f32 %v204_v54, %v3088_v47  ;;  %v226_v19 = vadd.f32 %v225_v59, %v3096_v51  ;;  %v247_v20 = vadd.f32 %v246_v60, %v3098_v52  ;;  %4360 = vst [vmem:[#allocation35_spill] sm:$0xff] %v3158_v36  ;;  %v3160_v8 = vld [vmem:[#allocation2 + $0x148] sm:$0xff]  ;;  %v3172_v45 = vld [vmem:[#allocation2 + $0x150] sm:$0xff]  ;;  %v3174_v12 = vld [vmem:[#allocation2 + $0x158] sm:$0xff] }
  0x7d   :  { %v185_v29 = vadd.f32 %v184_v2, %v3106_v57  ;;  %4361 = vst [vmem:[#allocation36_spill] sm:$0xff] %v3160_v8  ;;  %v3186_v54 = vld [vmem:[#allocation2 + $0x160] sm:$0xff]  ;;  %v3188_v16 = vld [vmem:[#allocation2 + $0x168] sm:$0xff]  ;;  %v3194_v2 = vmul.f32 %v3048_v21, %v3048_v21  ;;  %v3202_v18 = vld [vmem:[#allocation2 + $0x178] sm:$0xff]  ;;  %v3212_v21 = vmul.f32 %v3056_v26, %v3056_v26 }
  0x7e   :  { %v206_v32 = vadd.f32 %v205_v9, %v3108_v58  ;;  %v227_v37 = vadd.f32 %v226_v19, %v3118_v63  ;;  %v248_v40 = vadd.f32 %v247_v20, %v3120_v1  ;;  %4362 = vst [vmem:[#allocation37_spill] sm:$0xff] %v3186_v54  ;;  %4363 = vst [vmem:[#allocation38_spill] sm:$0xff] %v3188_v16  ;;  %v3200_v19 = vld [vmem:[#allocation2 + $0x170] sm:$0xff]  ;;  %v3230_v26 = vld [vmem:[#allocation2 + $0x198] sm:$0xff] }
  0x7f   :  { %v186_v48 = vadd.f32 %v185_v29, %v3130_v3  ;;  %v3198_v9 = vmul.f32 %v3050_v22, %v3050_v22  ;;  %4364 = vst [vmem:[#allocation39_spill] sm:$0xff] %v3200_v19  ;;  %4365 = vst [vmem:[#allocation40_spill] sm:$0xff] %v3202_v18  ;;  %v3216_v22 = vld [vmem:[#allocation2 + $0x188] sm:$0xff] }
  0x80   :  { %v207_v49 = vadd.f32 %v206_v32, %v3132_v15  ;;  %v228_v59 = vadd.f32 %v227_v37, %v3144_v28  ;;  %v249_v60 = vadd.f32 %v248_v40, %v3146_v6  ;;  %v3208_v32 = vmul.f32 %v3052_v23, %v3052_v23  ;;  %v3214_v37 = vld [vmem:[#allocation2 + $0x180] sm:$0xff]  ;;  %v3228_v23 = vld [vmem:[#allocation2 + $0x190] sm:$0xff]  ;;  %4367 = vst [vmem:[#allocation42_spill] sm:$0xff] %v3230_v26 }
  0x81   :  { %v187_v20 = vadd.f32 %v186_v48, %v3158_v36  ;;  %v3222_v48 = vmul.f32 %v3058_v27, %v3058_v27  ;;  %4366 = vst [vmem:[#allocation41_spill] sm:$0xff] %v3228_v23  ;;  %v3240_v27 = vmul.f32 %v3068_v34, %v3068_v34  ;;  %v3258_v34 = vld [vmem:[#allocation2 + $0x1b8] sm:$0xff] }
  0x82   :  { %v208_v29 = vadd.f32 %v207_v49, %v3160_v8  ;;  %v229_v40 = vadd.f32 %v228_v59, %v3172_v45  ;;  %v250_v17 = vadd.f32 %v249_v60, %v3174_v12  ;;  %v3226_v49 = vmul.f32 %v3062_v30, %v3062_v30  ;;  %v3242_v60 = vld [vmem:[#allocation2 + $0x1a0] sm:$0xff]  ;;  %v3244_v30 = vld [vmem:[#allocation2 + $0x1a8] sm:$0xff]  ;;  %4373 = vst [vmem:[#allocation48_spill] sm:$0xff] %v3258_v34 }
  0x83   :  { %v188_v11 = vadd.f32 %v187_v20, %v3186_v54  ;;  %v3236_v59 = vmul.f32 %v3064_v31, %v3064_v31  ;;  %4369 = vst [vmem:[#allocation44_spill] sm:$0xff] %v3240_v27  ;;  %v3250_v20 = vmul.f32 %v3070_v35, %v3070_v35  ;;  %v3256_v31 = vld [vmem:[#allocation2 + $0x1b0] sm:$0xff]  ;;  %v3270_v35 = vld [vmem:[#allocation2 + $0x1c0] sm:$0xff] }
  0x84   :  { %v209_v4 = vadd.f32 %v208_v29, %v3188_v16  ;;  %v230_v5 = vadd.f32 %v229_v40, %v3200_v19  ;;  %v251_v0 = vadd.f32 %v250_v17, %v3202_v18  ;;  %v3254_v29 = vmul.f32 %v3074_v38, %v3074_v38  ;;  %4372 = vst [vmem:[#allocation47_spill] sm:$0xff] %v3256_v31 }
  0x85   :  { %4368 = vst [vmem:[#allocation43_spill] sm:$0xff] %v3236_v59  ;;  %4370 = vst [vmem:[#allocation45_spill] sm:$0xff] %v3250_v20  ;;  %v189_v27 = vadd.f32 %v188_v11, %v3214_v37  ;;  %v3264_v40 = vmul.f32 %v3076_v39, %v3076_v39  ;;  %v3268_v17 = vmul.f32 %v3080_v42, %v3080_v42  ;;  %v3282_v11 = vld [vmem:[#allocation2 + $0x1c8] sm:$0xff] }
  0x86   :  { %4371 = vst [vmem:[#allocation46_spill] sm:$0xff] %v3254_v29  ;;  %v210_v59 = vadd.f32 %v209_v4, %v3216_v22  ;;  %v231_v38 = vadd.f32 %v230_v5, %v3228_v23  ;;  %v252_v20 = vadd.f32 %v251_v0, %v3230_v26  ;;  %v3276_v29 = vmul.f32 %v3082_v43, %v3082_v43  ;;  %v3294_v5 = vld [vmem:[#allocation2 + $0x1d0] sm:$0xff] }
  0x87   :  { %4374 = vst [vmem:[#allocation49_spill] sm:$0xff] %v3268_v17  ;;  %v3280_v4 = vmul.f32 %v3086_v46, %v3086_v46  ;;  %v190_v39 = vadd.f32 %v189_v27, %v3242_v60  ;;  %v3288_v17 = vmul.f32 %v3088_v47, %v3088_v47  ;;  %v3292_v0 = vmul.f32 %v3096_v51, %v3096_v51  ;;  %v3306_v27 = vld [vmem:[#allocation2 + $0x1d8] sm:$0xff]  ;;  %v3308_v47 = vld [vmem:[#allocation2 + $0x1e0] sm:$0xff] }
  0x88   :  { %4375 = vst [vmem:[#allocation50_spill] sm:$0xff] %v3276_v29  ;;  %v211_v42 = vadd.f32 %v210_v59, %v3244_v30  ;;  %4377 = vst [vmem:[#allocation52_spill] sm:$0xff] %v3294_v5  ;;  %v232_v43 = vadd.f32 %v231_v38, %v3256_v31  ;;  %v253_v46 = vadd.f32 %v252_v20, %v3258_v34 }
  0x89   :  { %4376 = vst [vmem:[#allocation51_spill] sm:$0xff] %v3292_v0  ;;  %v3300_v29 = vmul.f32 %v3098_v52, %v3098_v52  ;;  %v3304_v59 = vmul.f32 %v3106_v57, %v3106_v57  ;;  %4378 = vst [vmem:[#allocation53_spill] sm:$0xff] %v3306_v27  ;;  %v191_v51 = vadd.f32 %v190_v39, %v3270_v35 }
  0x8a   :  { %4379 = vst [vmem:[#allocation54_spill] sm:$0xff] %v3308_v47  ;;  %v3313_v0 = vmul.f32 %v3108_v58, %v3108_v58  ;;  %v3317_v38 = vmul.f32 %v3118_v63, %v3118_v63  ;;  %v3321_v52 = vmul.f32 %v3120_v1, %v3120_v1  ;;  %v212_v20 = vadd.f32 %v211_v42, %v3282_v11  ;;  %v3336_v63 = vld [vmem:[#allocation2 + $0x1e8] sm:$0xff] }
  0x8b   :  { %v3326_v57 = vmul.f32 %v3130_v3, %v3130_v3  ;;  %v3330_v39 = vmul.f32 %v3132_v15, %v3132_v15  ;;  %v3334_v58 = vmul.f32 %v3144_v28, %v3144_v28  ;;  %v3341_v1 = vmul.f32 %v3146_v6, %v3146_v6  ;;  %v3351_v15 = vld [vmem:[#allocation2 + $0x1f0] sm:$0xff] }
  0x8c   :  { %4380 = vst [vmem:[#allocation55_spill] sm:$0xff] %v3317_v38  ;;  %v233_v38 = vadd.f32 %v232_v43, %v3294_v5  ;;  %v3345_v42 = vmul.f32 %v3158_v36, %v3158_v36  ;;  %v3349_v3 = vmul.f32 %v3160_v8, %v3160_v8  ;;  %4383 = vst [vmem:[#allocation58_spill] sm:$0xff] %v3351_v15  ;;  %v3363_v36 = vld [vmem:[#allocation2 + $0x1f8] sm:$0xff] }
  0x8d   :  { %4381 = vst [vmem:[#allocation56_spill] sm:$0xff] %v3334_v58  ;;  %v192_v28 = vadd.f32 %v191_v51, %v3308_v47  ;;  %v254_v58 = vadd.f32 %v253_v46, %v3306_v27  ;;  %v3357_v43 = vmul.f32 %v3172_v45, %v3172_v45  ;;  %v3361_v6 = vmul.f32 %v3174_v12, %v3174_v12 }
  0x8e   :  { %4382 = vst [vmem:[#allocation57_spill] sm:$0xff] %v3349_v3  ;;  %4384 = vst [vmem:[#allocation59_spill] sm:$0xff] %v3363_v36  ;;  %v3367_v8 = vmul.f32 %v3186_v54, %v3186_v54  ;;  %v3371_v3 = vmul.f32 %v3188_v16, %v3188_v16  ;;  %v3375_v46 = vmul.f32 %v3200_v19, %v3200_v19 }
  0x8f   :  { %v326_v45 = vadd.f32 %v3116_v62, %v3094_v50  ;;  %v213_v12 = vadd.f32 %v212_v20, %v3336_v63  ;;  %v3382_v51 = vmul.f32 %v3202_v18, %v3202_v18  ;;  %v347_v54 = vadd.f32 %v3126_v10, %v3102_v55 }
  0x90   :  { %4385 = vst [vmem:[#allocation60_spill] sm:$0xff] %v3371_v3  ;;  %v368_v16 = vadd.f32 %v3128_v14, %v3104_v56  ;;  %v234_v3 = vadd.f32 %v233_v38, %v3351_v15  ;;  %v3391_v19 = vmul.f32 %v3214_v37, %v3214_v37  ;;  %v389_v62 = vadd.f32 %v3138_v24, %v3112_v61 }
  0x91   :  { %4386 = vst [vmem:[#allocation61_spill] sm:$0xff] %v3382_v51  ;;  %v327_v50 = vadd.f32 %v326_v45, %v3142_v25  ;;  %v193_v20 = vrot.slane %v192_v28, 4  ;;  %v255_v18 = vadd.f32 %v254_v58, %v3363_v36  ;;  %v348_v51 = vadd.f32 %v347_v54, %v3152_v33 }
  0x92   :  { %v369_v55 = vadd.f32 %v368_v16, %v3156_v7  ;;  %v3401_v56 = vmul.f32 %v3216_v22, %v3216_v22  ;;  %v3405_v10 = vmul.f32 %v3228_v23, %v3228_v23  ;;  %v390_v25 = vadd.f32 %v389_v62, %v3166_v41 }
  0x93   :  { %v328_v14 = vadd.f32 %v327_v50, %v3170_v44  ;;  %v214_v61 = vrot.slane %v213_v12, 4  ;;  %v3411_v58 = vmul.f32 %v3230_v26, %v3230_v26  ;;  %v349_v24 = vadd.f32 %v348_v51, %v3180_v53  ;;  %v3608_v26 = vld [vmem:[#allocation5 + $0x70] sm:$0xff] }
  0x94   :  { %v370_v33 = vadd.f32 %v369_v55, %v3184_v13  ;;  %v235_v7 = vrot.slane %v234_v3, 4  ;;  %v3417_v54 = vmul.f32 %v3242_v60, %v3242_v60  ;;  %v391_v44 = vadd.f32 %v390_v25, %v3194_v2  ;;  %v4389_v25 = vld [vmem:[#allocation46_spill] sm:$0xff] }
  0x95   :  { %v329_v16 = vadd.f32 %v328_v14, %v3198_v9  ;;  %v194_v38 = vadd.f32 %v193_v20, %v192_v28  ;;  %v256_v41 = vrot.slane %v255_v18, 4  ;;  %v350_v45 = vadd.f32 %v349_v24, %v3208_v32  ;;  %v4387_v32 = vld [vmem:[#allocation43_spill] sm:$0xff] }
  0x96   :  { %v371_v50 = vadd.f32 %v370_v33, %v3212_v21  ;;  %v3425_v53 = vmul.f32 %v3244_v30, %v3244_v30  ;;  %v3429_v13 = vmul.f32 %v3256_v31, %v3256_v31  ;;  %v392_v9 = vadd.f32 %v391_v44, %v3222_v48  ;;  %v4388_v21 = vld [vmem:[#allocation44_spill] sm:$0xff]  ;;  %v4390_v33 = vld [vmem:[#allocation45_spill] sm:$0xff] }
  0x97   :  { %v330_v51 = vadd.f32 %v329_v16, %v3226_v49  ;;  %v215_v62 = vadd.f32 %v214_v61, %v213_v12  ;;  %v3435_v2 = vmul.f32 %v3258_v34, %v3258_v34  ;;  %v351_v28 = vadd.f32 %v350_v45, %v4387_v32  ;;  %v4391_v61 = vld [vmem:[#allocation49_spill] sm:$0xff] }
  0x98   :  { %v372_v20 = vadd.f32 %v371_v50, %v4388_v21  ;;  %v236_v55 = vadd.f32 %v235_v7, %v234_v3  ;;  %v3441_v14 = vmul.f32 %v3270_v35, %v3270_v35  ;;  %v393_v49 = vadd.f32 %v392_v9, %v4390_v33  ;;  %v4392_v50 = vld [vmem:[#allocation50_spill] sm:$0xff] }
  0x99   :  { %v331_v24 = vadd.f32 %v330_v51, %v4389_v25  ;;  %v195_v16 = vrot.slane %v194_v38, 2  ;;  %v257_v48 = vadd.f32 %v256_v41, %v255_v18  ;;  %v352_v12 = vadd.f32 %v351_v28, %v3264_v40  ;;  %v4393_v41 = vld [vmem:[#allocation51_spill] sm:$0xff]  ;;  %v3469_v25 = vld [vmem:[#allocation8 + $0x8] sm:$0xff] }
  0x9a   :  { %v373_v44 = vadd.f32 %v372_v20, %v4391_v61  ;;  %v3449_v45 = vmul.f32 %v3282_v11, %v3282_v11  ;;  %v3453_v3 = vmul.f32 %v3294_v5, %v3294_v5  ;;  %v394_v51 = vadd.f32 %v393_v49, %v4392_v50  ;;  %v4394_v61 = vld [vmem:[#allocation55_spill] sm:$0xff] }
  0x9b   :  { %v332_v7 = vadd.f32 %v331_v24, %v3280_v4  ;;  %v216_v32 = vrot.slane %v215_v62, 2  ;;  %v3459_v18 = vmul.f32 %v3306_v27, %v3306_v27  ;;  %v353_v40 = vadd.f32 %v352_v12, %v3288_v17  ;;  %v3473_v17 = vld [vmem:[#allocation8 + $0x28] sm:$0xff]  ;;  %v3475_v12 = vld [vmem:[#allocation8] sm:$0xff] }
  0x9c   :  { %v374_v9 = vadd.f32 %v373_v44, %v4393_v41  ;;  %v237_v28 = vrot.slane %v236_v55, 2  ;;  %v3465_v21 = vmul.f32 %v3308_v47, %v3308_v47  ;;  %v395_v4 = vadd.f32 %v394_v51, %v3300_v29  ;;  %v3477_v44 = vld [vmem:[#allocation8 + $0x20] sm:$0xff]  ;;  %v3483_v29 = vld [vmem:[#allocation8 + $0x68] sm:$0xff]  ;;  %v3613_v47 = vld [vmem:[#allocation5 + $0x78] sm:$0xff] }
  0x9d   :  { %v333_v20 = vadd.f32 %v332_v7, %v3304_v59  ;;  %v196_v24 = vadd.f32 %v195_v16, %v194_v38  ;;  %v258_v33 = vrot.slane %v257_v48, 2  ;;  %v354_v49 = vadd.f32 %v353_v40, %v3313_v0  ;;  %v3481_v7 = vld [vmem:[#allocation8 + $0x48] sm:$0xff] }
  0x9e   :  { %v375_v50 = vadd.f32 %v374_v9, %v4394_v61  ;;  %v396_v59 = vadd.f32 %v395_v4, %v3321_v52  ;;  %v2463_v38 = vpack.c.bf16 %v3473_v17, %v3469_v25  ;;  %v2465_v0 = vpack.c.bf16 %v3477_v44, %v3475_v12  ;;  %v4395_v40 = vld [vmem:[#allocation56_spill] sm:$0xff]  ;;  %v3495_v52 = vld [vmem:[#allocation5 + $0x8] sm:$0xff] }
  0x9f   :  { %v334_v41 = vadd.f32 %v333_v20, %v3326_v57  ;;  %v217_v16 = vadd.f32 %v216_v32, %v215_v62  ;;  %v355_v51 = vadd.f32 %v354_v49, %v3330_v39  ;;  %v2467_v57 = vpack.c.bf16 %v3483_v29, %v3481_v7  ;;  %v3493_v20 = vld [vmem:[#allocation5] sm:$0xff]  ;;  %v4396_v32 = vld [vmem:[#allocation57_spill] sm:$0xff] }
  0xa0   :  { %v376_v9 = vadd.f32 %v375_v50, %v4395_v40  ;;  %v238_v4 = vadd.f32 %v237_v28, %v236_v55  ;;  %v323_v61 = vmul.f32 %v3336_v63, %v3336_v63  ;;  %v397_v27 = vadd.f32 %v396_v59, %v3341_v1  ;;  %2464 = vmatprep.subr.bf16.mxu0 %v2463_v38  ;;  %v3505_v40 = vld [vmem:[#allocation5 + $0x10] sm:$0xff]  ;;  %v3515_v38 = vld [vmem:[#allocation8 + $0x18] sm:$0xff] }
  0xa1   :  { %v335_v5 = vadd.f32 %v334_v41, %v3345_v42  ;;  %v259_v62 = vadd.f32 %v258_v33, %v257_v48  ;;  %v324_v39 = vmul.f32 %v3351_v15, %v3351_v15  ;;  %v356_v49 = vadd.f32 %v355_v51, %v4396_v32  ;;  %2466 = vmatpush1.bf16.xpose.msra.mxu0 %v2465_v0  ;;  %v4397_v41 = vld [vmem:[#allocation60_spill] sm:$0xff]  ;;  %v3517_v0 = vld [vmem:[#allocation8 + $0x38] sm:$0xff]  ;;  %v3519_v51 = vld [vmem:[#allocation5 + $0x18] sm:$0xff] }
  0xa2   :  { %v377_v50 = vadd.f32 %v376_v9, %v3357_v43  ;;  %v325_v55 = vmul.f32 %v3363_v36, %v3363_v36  ;;  %v398_v42 = vadd.f32 %v397_v27, %v3361_v6  ;;  %2468 = vmatprep.subr.bf16.mxu0 %v2467_v57  ;;  %v1184_v1 = vadd.f32 %v3495_v52, %v3493_v20  ;;  %v3523_v6 = vld [vmem:[#allocation8 + $0x40] sm:$0xff]  ;;  %v3532_v15 = vld [vmem:[#allocation5 + $0x20] sm:$0xff] }
  0xa3   :  { %v336_v28 = vadd.f32 %v335_v5, %v3367_v8  ;;  %v197_v48 = vrot.slane %v196_v24, 1  ;;  %v218_v33 = vrot.slane %v217_v16, 1  ;;  %v357_v59 = vadd.f32 %v356_v49, %v4397_v41  ;;  %v4398_v5 = vld [vmem:[#allocation61_spill] sm:$0xff]  ;;  %v3525_v57 = vld [vmem:[#allocation8 + $0x60] sm:$0xff] }
  0xa4   :  { %v378_v43 = vadd.f32 %v377_v50, %v3375_v46  ;;  %v239_v9 = vrot.slane %v238_v4, 1  ;;  %v399_v27 = vadd.f32 %v398_v42, %v4398_v5  ;;  %v1185_v32 = vadd.f32 %v1184_v1, %v3505_v40 }
  0xa5   :  { %v337_v8 = vadd.f32 %v336_v28, %v3391_v19  ;;  %v260_v49 = vrot.slane %v259_v62, 1  ;;  %v358_v46 = vadd.f32 %v357_v59, %v3401_v56  ;;  %v2469_v41 = vpack.c.bf16 %v3525_v57, %v3523_v6  ;;  %v3541_v59 = vld [vmem:[#allocation5 + $0x28] sm:$0xff] }
  0xa6   :  { %v379_v50 = vadd.f32 %v378_v43, %v3405_v10  ;;  %v400_v28 = vadd.f32 %v399_v27, %v3411_v58  ;;  %v2471_v42 = vpack.c.bf16 %v3517_v0, %v3515_v38  ;;  %v1186_v5 = vadd.f32 %v1185_v32, %v3519_v51 }
  0xa7   :  { %v338_v19 = vadd.f32 %v337_v8, %v3417_v54  ;;  %v198_v1 = vadd.f32 %v197_v48, %v196_v24  ;;  %v219_v36 = vadd.f32 %v218_v33, %v217_v16  ;;  %v359_v56 = vadd.f32 %v358_v46, %v3425_v53  ;;  %v3548_v24 = vld [vmem:[#allocation5 + $0x30] sm:$0xff]  ;;  %v3561_v48 = vld [vmem:[#allocation5 + $0x38] sm:$0xff] }
  0xa8   :  { %v380_v10 = vadd.f32 %v379_v50, %v3429_v13  ;;  %v240_v43 = vadd.f32 %v239_v9, %v238_v4  ;;  %v401_v54 = vadd.f32 %v400_v28, %v3435_v2  ;;  %v1187_v58 = vadd.f32 %v1186_v5, %v3532_v15  ;;  %v3568_v50 = vld [vmem:[#allocation5 + $0x40] sm:$0xff]  ;;  %v3575_v5 = vld [vmem:[#allocation5 + $0x48] sm:$0xff] }
  0xa9   :  { %v339_v31 = vadd.f32 %v338_v19, %v3441_v14  ;;  %v261_v8 = vadd.f32 %v260_v49, %v259_v62  ;;  %v360_v27 = vadd.f32 %v359_v56, %v3449_v45  ;;  %2470 = vmatpush1.bf16.xpose.msra.mxu0 %v2469_v41  ;;  %v1205_v53 = vmul.f32 %v3493_v20, %v3493_v20 }
  0xaa   :  { %v381_v32 = vadd.f32 %v380_v10, %v3453_v3  ;;  %v402_v16 = vadd.f32 %v401_v54, %v3459_v18  ;;  %2472 = vmatprep.subr.bf16.mxu0 %v2471_v42  ;;  %v1188_v2 = vadd.f32 %v1187_v58, %v3541_v59  ;;  %v1206_v14 = vmul.f32 %v3495_v52, %v3495_v52 }
  0xab   :  { %v340_v13 = vadd.f32 %v339_v31, %v3465_v21  ;;  %v361_v4 = vadd.f32 %v360_v27, %v323_v61  ;;  %v3557_v62 = vmul.f32 0.0078125, %v198_v1  ;;  %v3559_v3 = vmul.f32 0.0078125, %v219_v36 }
  0xac   :  { %v382_v45 = vadd.f32 %v381_v32, %v324_v39  ;;  %v403_v9 = vadd.f32 %v402_v16, %v325_v55  ;;  %v1189_v31 = vadd.f32 %v1188_v2, %v3548_v24  ;;  %v1207_v18 = vmul.f32 %v3505_v40, %v3505_v40 }
  0xad   :  { %v341_v33 = vrot.slane %v340_v13, 4  ;;  %v362_v21 = vrot.slane %v361_v4, 4  ;;  %v3566_v46 = vmul.f32 0.0078125, %v240_v43  ;;  %v1208_v61 = vmul.f32 %v3519_v51, %v3519_v51 }
  0xae   :  { %v383_v49 = vrot.slane %v382_v45, 4  ;;  %v404_v39 = vrot.slane %v403_v9, 4  ;;  %v1190_v41 = vadd.f32 %v1189_v31, %v3561_v48  ;;  %v1221_v19 = vadd.f32 %v1206_v14, %v1205_v53  ;;  %v3582_v53 = vld [vmem:[#allocation5 + $0x50] sm:$0xff] }
  0xaf   :  { %v342_v36 = vadd.f32 %v341_v33, %v340_v13  ;;  %v363_v55 = vadd.f32 %v362_v21, %v361_v4  ;;  %v3573_v42 = vmul.f32 0.0078125, %v261_v8  ;;  %v1209_v1 = vmul.f32 %v3532_v15, %v3532_v15 }
  0xb0   :  { %v384_v28 = vadd.f32 %v383_v49, %v382_v45  ;;  %v405_v10 = vadd.f32 %v404_v39, %v403_v9  ;;  %v1191_v43 = vadd.f32 %v1190_v41, %v3568_v50  ;;  %v1222_v54 = vadd.f32 %v1221_v19, %v1207_v18  ;;  %v3589_v9 = vld [vmem:[#allocation5 + $0x58] sm:$0xff]  ;;  %v3596_v19 = vld [vmem:[#allocation5 + $0x60] sm:$0xff] }
  0xb1   :  { %v343_v56 = vrot.slane %v342_v36, 2  ;;  %v364_v58 = vrot.slane %v363_v55, 2  ;;  %v418_v32 = vmul.f32 %v3557_v62, %v3557_v62  ;;  %v1210_v8 = vmul.f32 %v3541_v59, %v3541_v59 }
  0xb2   :  { %v385_v27 = vrot.slane %v384_v28, 2  ;;  %v406_v16 = vrot.slane %v405_v10, 2  ;;  %v1192_v2 = vadd.f32 %v1191_v43, %v3575_v5  ;;  %v1223_v14 = vadd.f32 %v1222_v54, %v1208_v61 }
  0xb3   :  { %v344_v13 = vadd.f32 %v343_v56, %v342_v36  ;;  %v365_v4 = vadd.f32 %v364_v58, %v363_v55  ;;  %v419_v33 = vmul.f32 %v3559_v3, %v3559_v3  ;;  %v1211_v31 = vmul.f32 %v3548_v24, %v3548_v24 }
  0xb4   :  { %v386_v45 = vadd.f32 %v385_v27, %v384_v28  ;;  %v407_v21 = vadd.f32 %v406_v16, %v405_v10  ;;  %v1193_v49 = vadd.f32 %v1192_v2, %v3582_v53  ;;  %v1224_v39 = vadd.f32 %v1223_v14, %v1209_v1  ;;  %v3603_v27 = vld [vmem:[#allocation5 + $0x68] sm:$0xff] }
  0xb5   :  { %v345_v18 = vrot.slane %v344_v13, 1  ;;  %v366_v36 = vrot.slane %v365_v4, 1  ;;  %v420_v61 = vmul.f32 %v3566_v46, %v3566_v46  ;;  %v1212_v55 = vmul.f32 %v3561_v48, %v3561_v48 }
  0xb6   :  { %v387_v41 = vrot.slane %v386_v45, 1  ;;  %v408_v56 = vrot.slane %v407_v21, 1  ;;  %v1194_v43 = vadd.f32 %v1193_v49, %v3589_v9  ;;  %v1225_v54 = vadd.f32 %v1224_v39, %v1210_v8 }
  0xb7   :  { %v346_v28 = vadd.f32 %v345_v18, %v344_v13  ;;  %v367_v58 = vadd.f32 %v366_v36, %v365_v4  ;;  %v421_v1 = vmul.f32 %v3573_v42, %v3573_v42  ;;  %v1213_v16 = vmul.f32 %v3568_v50, %v3568_v50 }
  0xb8   :  { %v388_v10 = vadd.f32 %v387_v41, %v386_v45  ;;  %v409_v2 = vadd.f32 %v408_v56, %v407_v21  ;;  %v1195_v34 = vadd.f32 %v1194_v43, %v3596_v19  ;;  %v1226_v23 = vadd.f32 %v1225_v54, %v1211_v31 }
  0xb9   :  { %v414_v14 = vmul.f32 0.0078125, %v346_v28  ;;  %v415_v13 = vmul.f32 0.0078125, %v367_v58  ;;  %v1214_v8 = vmul.f32 %v3575_v5, %v3575_v5  ;;  %v1215_v21 = vmul.f32 %v3582_v53, %v3582_v53 }
  0xba   :  { %v416_v18 = vmul.f32 0.0078125, %v388_v10  ;;  %v417_v4 = vmul.f32 0.0078125, %v409_v2  ;;  %v1196_v49 = vadd.f32 %v1195_v34, %v3603_v27  ;;  %v1227_v39 = vadd.f32 %v1226_v23, %v1212_v55 }
  0xbb   :  { %v422_v45 = vsub.f32 %v414_v14, %v418_v32  ;;  %v423_v36 = vsub.f32 %v415_v13, %v419_v33  ;;  %v1216_v32 = vmul.f32 %v3589_v9, %v3589_v9  ;;  %v2884_v33 = vmov 1966171168  }
  0xbc   :  { %v424_v41 = vsub.f32 %v416_v18, %v420_v61  ;;  %v425_v31 = vsub.f32 %v417_v4, %v421_v1  ;;  %v1197_v56 = vadd.f32 %v1196_v49, %v3608_v26  ;;  %v1228_v43 = vadd.f32 %v1227_v39, %v1213_v16 }
  0xbd   :  { %v429_v28 = vadd.f32 1e-05, %v422_v45  ;;  %v430_v54 = vadd.f32 1e-05, %v423_v36  ;;  %v444_v61 = vunpack.c.l.s4 %v2884_v33  ;;  %v446_v55 = vlaneseq }
  0xbe   :  { %v431_v58 = vadd.f32 1e-05, %v424_v41  ;;  %v432_v10 = vadd.f32 1e-05, %v425_v31  ;;  %v1198_v23 = vadd.f32 %v1197_v56, %v3613_v47  ;;  %v1229_v34 = vadd.f32 %v1228_v43, %v1214_v8 }
  0xbf   :  { %2607 = vrsqrt.f32 %v429_v28  ;;  %v1217_v2 = vmul.f32 %v3596_v19, %v3596_v19  ;;  %v1218_v14 = vmul.f32 %v3603_v27, %v3603_v27  ;;  %v445_v4 = vunpack.c.0.s8 %v444_v61 }
  0xc0   :  { %2609 = vrsqrt.f32 %v430_v54  ;;  %v1199_v1 = vrot.slane %v1198_v23, 4  ;;  %v1230_v16 = vadd.f32 %v1229_v34, %v1215_v21  ;;  %v3625_v45 = vshrl.u32 %v446_v55, 7 }
  0xc1   :  { %2611 = vrsqrt.f32 %v431_v58  ;;  %v1219_v8 = vmul.f32 %v3608_v26, %v3608_v26  ;;  %v1220_v39 = vmul.f32 %v3613_v47, %v3613_v47 }
  0xc2   :  { %2613 = vrsqrt.f32 %v432_v10  ;;  %v1231_v13 = vadd.f32 %v1230_v16, %v1216_v32  ;;  %v1200_v18 = vadd.f32 %v1199_v1, %v1198_v23  ;;  %v3632_v21 = vsub.s32 %v445_v4, %v3625_v45 }
  0xc3   :  { %v3638_v4 = vsub.s32 1, %v3625_v45 }
  0xc4   :  { %v1232_v49 = vadd.f32 %v1231_v13, %v1217_v2  ;;  %v1201_v41 = vrot.slane %v1200_v18, 2 }
  0xc6   :  { %v1233_v36 = vadd.f32 %v1232_v49, %v1218_v14  ;;  %v1202_v10 = vadd.f32 %v1201_v41, %v1200_v18  ;;  %v426_v14 = vld [vmem:[#allocation7] ss:$2 sm:$0xf] }
  0xc8   :  { %v1234_v28 = vadd.f32 %v1233_v36, %v1219_v8  ;;  %v1203_v1 = vrot.slane %v1202_v10, 1  ;;  %v3641_v8 = vsub.s32 0, %v3625_v45  ;;  %v482_v36 = vsub.s32 3, %v3625_v45 }
  0xc9   :  { %v2608_v31 = vpop.eup %2607 }
  0xca   :  { %v2610_v56 = vpop.eup %2609  ;;  %v1235_v58 = vadd.f32 %v1234_v28, %v1220_v39  ;;  %v1204_v49 = vadd.f32 %v1203_v1, %v1202_v10  ;;  %v3647_v28 = vsub.s32 2, %v3625_v45 }
  0xcb   :  { %v2612_v43 = vpop.eup %2611  ;;  %v441_v54 = vcombine.low %v2608_v31, %v2610_v56 }
  0xcc   :  { %v2614_v32 = vpop.eup %2613  ;;  %v1236_v33 = vrot.slane %v1235_v58, 4 }
  0xcd   :  { %v442_v23 = vcombine.low %v2612_v43, %v2614_v32  ;;  %v449_v34 = vrot.slane %v441_v54, %v3632_v21  ;;  %v3649_v43 = vmul.f32 0.0078125, %v1204_v49 }
  0xce   :  { %v1237_v55 = vadd.f32 %v1236_v33, %v1235_v58 }
  0xcf   :  { %v456_v61 = vrot.slane %v442_v23, %v3632_v21 }
  0xd0   :  { %v1238_v16 = vrot.slane %v1237_v55, 2 }
  0xd1   :  { %v457_v2 = vcombine.low %v449_v34, %v456_v61 }
  0xd2   :  { %v1239_v18 = vadd.f32 %v1238_v16, %v1237_v55 }
  0xd3   :  { %v464_v13 = vrot.slane %v457_v2, %v3632_v21 }
  0xd4   :  { %v1240_v56 = vrot.slane %v1239_v18, 1 }
  0xd5   :  { %v466_v39 = vmul.f32 %v464_v13, %v426_v14 }
  0xd6   :  { %v1241_v2 = vadd.f32 %v1240_v56, %v1239_v18 }
  0xd7   :  { %v475_v41 = vrot.slane %v466_v39, %v3638_v4  ;;  %v471_v31 = vrot.slane %v466_v39, %v3641_v8  ;;  %v483_v33 = vrot.slane %v466_v39, %v482_v36  ;;  %v479_v1 = vrot.slane %v466_v39, %v3647_v28 }
  0xd9   :  { %v539_v54 = vmul.f32 %v3469_v25, %v475_v41  ;;  %v543_v58 = vmul.f32 %v3473_v17, %v475_v41  ;;  %v538_v32 = vmul.f32 %v3475_v12, %v471_v31  ;;  %v542_v10 = vmul.f32 %v3477_v44, %v471_v31 }
  0xda   :  { %v547_v23 = vmul.f32 %v3481_v7, %v475_v41  ;;  %v551_v34 = vmul.f32 %v3483_v29, %v475_v41  ;;  %v546_v25 = vmul.f32 %v3523_v6, %v471_v31  ;;  %v1244_v17 = vmul.f32 %v3649_v43, %v3649_v43 }
  0xdb   :  { %v2479_v61 = vpack.c.bf16 %v543_v58, %v539_v54  ;;  %v2481_v55 = vpack.c.bf16 %v542_v10, %v538_v32  ;;  %v550_v12 = vmul.f32 %v3525_v57, %v471_v31  ;;  %v541_v44 = vmul.f32 %v3515_v38, %v483_v33  ;;  %v533_v32 = vld [vmem:[#allocation8 + $0x58] sm:$0xff] }
  0xdc   :  { %v2483_v16 = vpack.c.bf16 %v551_v34, %v547_v23  ;;  %v488_v7 = vmul.f32 %v471_v31, %v3557_v62  ;;  %v489_v29 = vmul.f32 %v475_v41, %v3559_v3  ;;  %v545_v14 = vmul.f32 %v3517_v0, %v483_v33  ;;  %v524_v31 = vld [vmem:[#allocation8 + $0x10] sm:$0xff]  ;;  %v428_v10 = vld [vmem:[#allocation7 + $0x1] ss:$2 sm:$0xf] }
  0xdd   :  { %2480 = vmatprep.subr.bf16.mxu1 %v2479_v61  ;;  %v490_v13 = vmul.f32 %v479_v1, %v3566_v46  ;;  %v491_v18 = vmul.f32 %v483_v33, %v3573_v42  ;;  %v1243_v6 = vmul.f32 0.0078125, %v1241_v2  ;;  %v2485_v54 = vpack.c.bf16 %v550_v12, %v546_v25  ;;  %v528_v3 = vld [vmem:[#allocation8 + $0x30] sm:$0xff]  ;;  %v537_v42 = vld [vmem:[#allocation8 + $0x78] sm:$0xff] }
  0xde   :  { %2482 = vmatpush1.bf16.xpose.msra.mxu1 %v2481_v55  ;;  %v496_v49 = vcombine.low %v488_v7, %v489_v29  ;;  %v2487_v58 = vpack.c.bf16 %v545_v14, %v541_v44  ;;  %v540_v0 = vmul.f32 %v524_v31, %v479_v1  ;;  %v544_v46 = vmul.f32 %v528_v3, %v479_v1  ;;  %v4399_v7 = vld [vmem:[#allocation19_spill] sm:$0xff]  ;;  %v532_v29 = vld [vmem:[#allocation8 + $0x50] sm:$0xff] }
  0xdf   :  { %2484 = vmatprep.subr.bf16.mxu1 %v2483_v16  ;;  %v497_v39 = vcombine.low %v490_v13, %v491_v18  ;;  %v1245_v56 = vsub.f32 %v1243_v6, %v1244_v17  ;;  %v549_v23 = vmul.f32 %v533_v32, %v483_v33  ;;  %v553_v34 = vmul.f32 %v537_v42, %v483_v33  ;;  %v536_v14 = vld [vmem:[#allocation8 + $0x70] sm:$0xff]  ;;  %v1246_v33 = vld [vmem:[%s4306_s3] sm:$0x1] }
  0xe0   :  { %v504_v57 = vrot.slane %v496_v49, %v3632_v21  ;;  %v2489_v2 = vpack.c.bf16 %v544_v46, %v540_v0  ;;  %v2473_v12 = vpack.c.bf16 %v528_v3, %v524_v31  ;;  %v2475_v13 = vpack.c.bf16 %v537_v42, %v533_v32  ;;  %v4403_v0 = vld [vmem:[#allocation23_spill] sm:$0xff]  ;;  %v3691_v32 = vld [vmem:[#allocation10 + $0x10] sm:$0xff]  ;;  %v3693_v42 = vld [vmem:[#allocation10 + $0x18] sm:$0xff] }
  0xe1   :  { %v511_v38 = vrot.slane %v497_v39, %v3632_v21  ;;  %v1248_v62 = vadd.f32 1e-05, %v1245_v56  ;;  %v2491_v16 = vpack.c.bf16 %v553_v34, %v549_v23  ;;  %v548_v18 = vmul.f32 %v532_v29, %v479_v1  ;;  %v4401_v39 = vld [vmem:[#allocation20_spill] sm:$0xff]  ;;  %v3679_v56 = vld [vmem:[#allocation10] sm:$0xff] }
  0xe2   :  { %v552_v6 = vmul.f32 %v536_v14, %v479_v1 }
  0xe3   :  { %v512_v41 = vcombine.low %v504_v57, %v511_v38  ;;  %2615 = vrsqrt.f32 %v1248_v62  ;;  %v4402_v57 = vld [vmem:[#allocation22_spill] sm:$0xff]  ;;  %v2477_v62 = vpack.c.bf16 %v536_v14, %v532_v29  ;;  %v4411_v14 = vld [vmem:[#allocation32_spill] sm:$0xff] }
  0xe4   :  { %v4409_v29 = vld [vmem:[#allocation30_spill] sm:$0xff] }
  0xe5   :  { %v519_v61 = vrot.slane %v512_v41, %v3632_v21  ;;  %v4400_v21 = vld [vmem:[#allocation21_spill] sm:$0xff]  ;;  %v2685_v41 = vld [vmem:[#allocation2 + $0x40] sm:$0xff] }
  0xe6   :  { %2486 = vmatpush1.bf16.xpose.msra.mxu1 %v2485_v54  ;;  %v3681_v54 = vld [vmem:[#allocation10 + $0x8] sm:$0xff] }
  0xe7   :  { %2488 = vmatprep.subr.bf16.mxu1 %v2487_v58  ;;  %v521_v55 = vsub.f32 %v428_v10, %v519_v61  ;;  %v2493_v58 = vpack.c.bf16 %v552_v6, %v548_v18  ;;  %v2885_v10 = vmov 0.0|0.0   ;;  %v4404_v61 = vld [vmem:[#allocation24_spill] sm:$0xff]  ;;  %v4416_v18 = vld [vmem:[#allocation35_spill] sm:$0xff]  ;;  %v4417_v6 = vld [vmem:[#allocation38_spill] sm:$0xff] }
  0xe9   :  { %v562_v25 = vrot.slane %v521_v55, %v3638_v4  ;;  %v558_v17 = vrot.slane %v521_v55, %v3641_v8  ;;  %v570_v44 = vrot.slane %v521_v55, %v482_v36 }
  0xeb   :  { %639 = vmatprep.mubr.f32.mxu0 %v562_v25 }
  0xec   :  { %640 = vmatmul.mubr.f32.vlgmr.msra.gmra.mrb[0].mxu0 %v558_v17  ;;  %v4405_v17 = vld [vmem:[#allocation26_spill] sm:$0xff] }
  0xed   :  { %784 = vmatmul.mubr.f32.vlgmr.msra.gmra.mrb[0].mxu1 %v4399_v7  ;;  %v2616_v49 = vpop.eup %2615  ;;  %2474 = vmatpush1.bf16.xpose.msra.mxu0 %v2473_v12  ;;  %v4406_v12 = vld [vmem:[#allocation25_spill] sm:$0xff]  ;;  %v4408_v7 = vld [vmem:[#allocation27_spill] sm:$0xff] }
  0xee   :  { %2490 = vmatpush1.bf16.xpose.msra.mxu1 %v2489_v2  ;;  %788 = vmatprep.mubr.f32.mxu1 %v4400_v21  ;;  %v1250_v36 = vmul.f32 %v2616_v49, %v1246_v33  ;;  %v566_v2 = vrot.slane %v521_v55, %v3647_v28  ;;  %v4410_v55 = vld [vmem:[#allocation29_spill] sm:$0xff]  ;;  %v4413_v33 = vld [vmem:[#allocation34_spill] sm:$0xff]  ;;  %v4415_v21 = vld [vmem:[#allocation36_spill] sm:$0xff] }
  0xef   :  { %2492 = vmatprep.subr.bf16.mxu1 %v2491_v16  ;;  %709 = vmatprep.mubr.f32.mxu0 %v570_v44  ;;  %v2687_v16 = vld [vmem:[#allocation2 + $0x80] sm:$0xff]  ;;  %v4407_v44 = vld [vmem:[#allocation28_spill] sm:$0xff]  ;;  %v4418_v49 = vld [vmem:[#allocation37_spill] sm:$0xff] }
  0xf0   :  { %2476 = vmatprep.subr.bf16.mxu0 %v2475_v13  ;;  %v1260_v38 = vrot.slane %v1250_v36, %v3641_v8  ;;  %v3686_v1 = vmul.f32 %v1250_v36, %v3649_v43  ;;  %v2686_v43 = vld [vmem:[#allocation2 + $0x60] sm:$0xff]  ;;  %v4412_v13 = vld [vmem:[#allocation31_spill] sm:$0xff]  ;;  %v2707_v36 = vld [vmem:[#allocation2 + $0x130] sm:$0xff] }
  0xf1   :  { %789 = vmatmul.mubr.f32.gmra.mrb[2].mxu1 %v4401_v39  ;;  %v2708_v39 = vld [vmem:[#allocation2 + $0x158] sm:$0xff] }
  0xf2   :  { %793 = vmatprep.mubr.f32.mxu1 %v4402_v57  ;;  %v1261_v31 = vmul.f32 %v1260_v38, %v3679_v56  ;;  %v1262_v3 = vmul.f32 %v1260_v38, %v3681_v54  ;;  %v1263_v23 = vmul.f32 %v1260_v38, %v3691_v32  ;;  %v1264_v34 = vmul.f32 %v1260_v38, %v3693_v42  ;;  %v4421_v57 = vld [vmem:[#allocation39_spill] sm:$0xff]  ;;  %v4423_v38 = vld [vmem:[#allocation41_spill] sm:$0xff] }
  0xf4   :  { %v2501_v46 = vpack.c.bf16 %v1262_v3, %v1261_v31  ;;  %v2505_v25 = vpack.c.bf16 %v1264_v34, %v1263_v23  ;;  %v4425_v31 = vld [vmem:[#allocation47_spill] sm:$0xff]  ;;  %v4426_v3 = vld [vmem:[#allocation53_spill] sm:$0xff] }
  0xf5   :  { %794 = vmatmul.mubr.f32.gmra.mrb[4].mxu1 %v2685_v41  ;;  %2478 = vmatpush1.bf16.xpose.msra.mxu0 %v2477_v62  ;;  %v4424_v62 = vld [vmem:[#allocation48_spill] sm:$0xff] }
  0xf6   :  { %798 = vmatprep.mubr.f32.mxu1 %v4403_v0  ;;  %2494 = vmatpush1.bf16.xpose.msra.mxu1 %v2493_v58  ;;  %v4422_v58 = vld [vmem:[#allocation42_spill] sm:$0xff]  ;;  %v4427_v41 = vld [vmem:[#allocation52_spill] sm:$0xff]  ;;  %v4428_v0 = vld [vmem:[#allocation59_spill] sm:$0xff] }
  0xf7   :  { %2495 = vmatprep.subr.bf16.mxu1 %v2885_v10  ;;  %2502 = vmatprep.subr.bf16.mxu0 %v2501_v46 }
  0xf9   :  { %799 = vmatmul.mubr.f32.gmra.mrb[6].mxu1 %v2686_v43 }
  0xfa   :  { %803 = vmatprep.mubr.f32.mxu1 %v4404_v61 }
  0xfc   :  { %710 = vmatmul.mubr.f32.vlgmr.msra.gmra.mrb[0].mxu0 %v566_v2 }
  0xfd   :  { %804 = vmatmul.mubr.f32.gmra.mrb[8].mxu1 %v2687_v16  ;;  %2504 = vmatpush3.bf16.xpose.msra.mxu0 %v2501_v46  ;;  %v1247_v46 = vld [vmem:[%s4306_s3 + $0x1] sm:$0x1] }
  0xfe   :  { %808 = vmatprep.mubr.f32.mxu1 %v4405_v17  ;;  %2375 = vmatprep.mubr.f32.mxu0 %v3493_v20  ;;  %v4414_v20 = vld [vmem:[#allocation33_spill] sm:$0xff] }
  0xff   :  { %2506 = vmatprep.subr.bf16.mxu0 %v2505_v25 }
 0x101   :  { %809 = vmatmul.mubr.f32.gmra.mrb[10].mxu1 %v4406_v12 }
 0x102   :  { %813 = vmatprep.mubr.f32.mxu1 %v4407_v44 }
 0x105   :  { %814 = vmatmul.mubr.f32.gmra.mrb[12].mxu1 %v4408_v7  ;;  %2508 = vmatpush3.bf16.xpose.msra.mxu0 %v2505_v25 }
 0x106   :  { %818 = vmatprep.mubr.f32.mxu1 %v4409_v29  ;;  %v3778_v29 = vld [vmem:[%s4309_s6] sm:$0xff] }
 0x109   :  { %819 = vmatmul.mubr.f32.gmra.mrb[14].mxu1 %v4410_v55 }
 0x10a   :  { %823 = vmatprep.mubr.f32.mxu1 %v4411_v14 }
 0x10c   :  { %2376 = vmatmul.mubr.f32.vlgmr.msra.gmra.mrb[2].mxu0 %v3495_v52  ;;  %v2694_v52 = vld [vmem:[#allocation2 + $0x78] sm:$0xff] }
 0x10d   :  { %824 = vmatmul.mubr.f32.gmra.mrb[16].mxu1 %v4412_v13  ;;  %2378 = vmatprep.mubr.f32.mxu0 %v3505_v40  ;;  %v2695_v40 = vld [vmem:[#allocation2 + $0x70] sm:$0xff] }
 0x10e   :  { %828 = vmatprep.mubr.f32.mxu1 %v4413_v33 }
 0x110   :  { %2379 = vmatmul.mubr.f32.gmra.mrb[4].mxu0 %v3519_v51  ;;  %v2697_v51 = vld [vmem:[#allocation2 + $0x90] sm:$0xff] }
 0x111   :  { %829 = vmatmul.mubr.f32.gmra.mrb[18].mxu1 %v4414_v20  ;;  %2381 = vmatprep.mubr.f32.mxu0 %v3532_v15  ;;  %v2688_v15 = vld [vmem:[#allocation2 + $0x18] sm:$0xff] }
 0x112   :  { %833 = vmatprep.mubr.f32.mxu1 %v4415_v21 }
 0x114   :  { %2382 = vmatmul.mubr.f32.gmra.mrb[6].mxu0 %v3541_v59  ;;  %v2698_v59 = vld [vmem:[#allocation2 + $0xb8] sm:$0xff] }
 0x115   :  { %834 = vmatmul.mubr.f32.gmra.mrb[20].mxu1 %v4416_v18  ;;  %2384 = vmatprep.mubr.f32.mxu0 %v3548_v24  ;;  %v2699_v24 = vld [vmem:[#allocation2 + $0xb0] sm:$0xff] }
 0x116   :  { %838 = vmatprep.mubr.f32.mxu1 %v4417_v6 }
 0x118   :  { %2385 = vmatmul.mubr.f32.gmra.mrb[8].mxu0 %v3561_v48  ;;  %v2700_v48 = vld [vmem:[#allocation2 + $0xd8] sm:$0xff] }
 0x119   :  { %839 = vmatmul.mubr.f32.gmra.mrb[22].mxu1 %v4418_v49  ;;  %2387 = vmatprep.mubr.f32.mxu0 %v3568_v50  ;;  %v2701_v50 = vld [vmem:[#allocation2 + $0xd0] sm:$0xff] }
 0x11a   :  { %843 = vmatprep.mubr.f32.mxu1 %v3216_v22  ;;  %v2689_v22 = vld [vmem:[#allocation2 + $0x10] sm:$0xff] }
 0x11c   :  { %2388 = vmatmul.mubr.f32.gmra.mrb[10].mxu0 %v3575_v5  ;;  %v2702_v5 = vld [vmem:[#allocation2 + $0xf8] sm:$0xff] }
 0x11d   :  { %844 = vmatmul.mubr.f32.gmra.mrb[24].mxu1 %v3214_v37  ;;  %2390 = vmatprep.mubr.f32.mxu0 %v3582_v53  ;;  %v2496_v37 = vpack.c.bf16 %v3681_v54, %v3679_v56  ;;  %v2703_v53 = vld [vmem:[#allocation2 + $0xf0] sm:$0xff] }
 0x11e   :  { %848 = vmatprep.mubr.f32.mxu1 %v3244_v30  ;;  %v4419_v30 = vld [vmem:[#allocation54_spill] sm:$0xff]  ;;  %v2709_v56 = vld [vmem:[#allocation2 + $0x150] sm:$0xff] }
 0x11f   :  { %v4420_v54 = vld [vmem:[#allocation40_spill] sm:$0xff] }
 0x120   :  { %2391 = vmatmul.mubr.f32.gmra.mrb[12].mxu0 %v3589_v9  ;;  %v2704_v9 = vld [vmem:[#allocation2 + $0x118] sm:$0xff] }
 0x121   :  { %849 = vmatmul.mubr.f32.gmra.mrb[26].mxu1 %v3242_v60  ;;  %2393 = vmatprep.mubr.f32.mxu0 %v3596_v19  ;;  %v2690_v60 = vld [vmem:[#allocation2 + $0x38] sm:$0xff]  ;;  %v2705_v19 = vld [vmem:[#allocation2 + $0x110] sm:$0xff] }
 0x122   :  { %853 = vmatprep.mubr.f32.mxu1 %v3282_v11  ;;  %v2692_v11 = vld [vmem:[#allocation2 + $0x58] sm:$0xff] }
 0x124   :  { %2394 = vmatmul.mubr.f32.gmra.mrb[14].mxu0 %v3603_v27  ;;  %v2706_v27 = vld [vmem:[#allocation2 + $0x138] sm:$0xff] }
 0x125   :  { %854 = vmatmul.mubr.f32.gmra.mrb[28].mxu1 %v3270_v35  ;;  %2396 = vmatprep.mubr.f32.mxu0 %v3608_v26  ;;  %v2691_v35 = vld [vmem:[#allocation2 + $0x30] sm:$0xff]  ;;  %v2499_v26 = vpack.c.bf16 %v3693_v42, %v3691_v32  ;;  %v4429_v32 = vld [vmem:[#allocation58_spill] sm:$0xff]  ;;  %v1252_v42 = vsub.f32 %v1247_v46, %v3686_v1 }
 0x126   :  { %858 = vmatprep.mubr.f32.mxu1 %v3336_v63  ;;  %v2693_v63 = vld [vmem:[#allocation2 + $0x50] sm:$0xff] }
 0x128   :  { %2397 = vmatmul.mubr.f32.gmra.mrb[16].mxu0 %v3613_v47  ;;  %v2696_v47 = vld [vmem:[#allocation2 + $0x98] sm:$0xff] }
 0x129   :  { %859 = vmatmul.mubr.f32.gmra.mrb[30].mxu1 %v4419_v30 }
 0x12a   :  { %928 = vmatprep.mubr.f32.mxu1 %v2688_v15 }
 0x12d   :  { %929 = vmatmul.mubr.f32.vlgmr.msra.gmra.mrb[0].mxu1 %v2689_v22 }
 0x12e   :  { %2497 = vmatpush3.bf16.xpose.msra.mxu1 %v2496_v37  ;;  %933 = vmatprep.mubr.f32.mxu1 %v2690_v60 }
 0x12f   :  { %2498 = vmatprep.subr.bf16.mxu1 %v2885_v10  ;;  %v2887_v10 = vmov 0.0  }
 0x131   :  { %934 = vmatmul.mubr.f32.gmra.mrb[2].mxu1 %v2691_v35 }
 0x132   :  { %938 = vmatprep.mubr.f32.mxu1 %v2692_v11 }
 0x135   :  { %939 = vmatmul.mubr.f32.gmra.mrb[4].mxu1 %v2693_v63 }
 0x136   :  { %943 = vmatprep.mubr.f32.mxu1 %v2694_v52  ;;  %2500 = vmatpush3.bf16.xpose.msra.mxu1 %v2499_v26 }
 0x139   :  { %944 = vmatmul.mubr.f32.gmra.mrb[6].mxu1 %v2695_v40 }
 0x13a   :  { %948 = vmatprep.mubr.f32.mxu1 %v2696_v47 }
 0x13d   :  { %949 = vmatmul.mubr.f32.gmra.mrb[8].mxu1 %v2697_v51 }
 0x13e   :  { %953 = vmatprep.mubr.f32.mxu1 %v2698_v59 }
 0x141   :  { %954 = vmatmul.mubr.f32.gmra.mrb[10].mxu1 %v2699_v24 }
 0x142   :  { %958 = vmatprep.mubr.f32.mxu1 %v2700_v48 }
 0x145   :  { %959 = vmatmul.mubr.f32.gmra.mrb[12].mxu1 %v2701_v50 }
 0x146   :  { %963 = vmatprep.mubr.f32.mxu1 %v2702_v5 }
 0x149   :  { %964 = vmatmul.mubr.f32.gmra.mrb[14].mxu1 %v2703_v53 }
 0x14a   :  { %968 = vmatprep.mubr.f32.mxu1 %v2704_v9 }
 0x14d   :  { %969 = vmatmul.mubr.f32.gmra.mrb[16].mxu1 %v2705_v19 }
 0x14e   :  { %973 = vmatprep.mubr.f32.mxu1 %v2706_v27 }
 0x151   :  { %974 = vmatmul.mubr.f32.gmra.mrb[18].mxu1 %v2707_v36 }
 0x152   :  { %978 = vmatprep.mubr.f32.mxu1 %v2708_v39 }
 0x155   :  { %979 = vmatmul.mubr.f32.gmra.mrb[20].mxu1 %v2709_v56 }
 0x156   :  { %983 = vmatprep.mubr.f32.mxu1 %v4420_v54 }
 0x159   :  { %984 = vmatmul.mubr.f32.gmra.mrb[22].mxu1 %v4421_v57  ;;  %v1649_v57 = vld [vmem:[#allocation11 + $0x20] sm:$0xff] }
 0x15a   :  { %988 = vmatprep.mubr.f32.mxu1 %v4422_v58  ;;  %v1650_v58 = vld [vmem:[#allocation11 + $0x28] sm:$0xff] }
 0x15d   :  { %989 = vmatmul.mubr.f32.gmra.mrb[24].mxu1 %v4423_v38  ;;  %v1651_v38 = vld [vmem:[#allocation11 + $0x30] sm:$0xff] }
 0x15e   :  { %993 = vmatprep.mubr.f32.mxu1 %v4424_v62 }
 0x161   :  { %994 = vmatmul.mubr.f32.gmra.mrb[26].mxu1 %v4425_v31 }
 0x162   :  { %998 = vmatprep.mubr.f32.mxu1 %v4426_v3 }
 0x165   :  { %999 = vmatmul.mubr.f32.gmra.mrb[28].mxu1 %v4427_v41  ;;  %v2509_v41 = vpack.c.bf16 %v1650_v58, %v1649_v57 }
 0x166   :  { %1003 = vmatprep.mubr.f32.mxu1 %v4428_v0  ;;  %v1652_v0 = vld [vmem:[#allocation11 + $0x38] sm:$0xff] }
 0x167   :  { %2510 = vmatprep.subr.bf16.mxu0 %v2509_v41 }
 0x168   :  { %2512 = vmatpush3.bf16.msra.mxu0 %v2509_v41 }
 0x169   :  { %1004 = vmatmul.mubr.f32.gmra.mrb[30].mxu1 %v4429_v32 }
 0x16a   :  { %2364 = vmatprep.mubr.msk.f32.mxu1 %vm2886_vm0, %v2887_v10  ;;  %v2513_v10 = vpack.c.bf16 %v1652_v0, %v1651_v38 }
 0x16c   :  { %2514 = vmatprep.subr.bf16.mxu0 %v2513_v10 }
 0x16d   :  { %2365 = vmatmul.mubr.f32.vlgmr.msra.gmra.mrb[32].mxu1 %v1252_v42  ;;  %2516 = vmatpush3.bf16.msra.mxu0 %v2513_v10 }
 0x1cf   :  { %v711_v43 = vpop.f32.mrb[0].mxu0 }
 0x1d0   :  { %v713_v23 = vpop.f32.mrb[1].mxu0  ;;  %v2525_v13 = vadd.f32 %v711_v43, %v3778_v29 }
 0x1d2   :  { %v3790_v21 = vrot.slane %v2525_v13, %v3641_v8 }
 0x1df   :  { %v3755_v34 = vpop.f32.mrb[2].mxu0 }
 0x1e0   :  { %v3757_v61 = vpop.f32.mrb[3].mxu0 }
 0x1e3   :  { %v3759_v2 = vpop.f32.mrb[4].mxu0 }
 0x1e4   :  { %v3761_v16 = vpop.f32.mrb[5].mxu0 }
 0x1e7   :  { %v3763_v25 = vpop.f32.mrb[6].mxu0 }
 0x1e8   :  { %v3765_v17 = vpop.f32.mrb[7].mxu0 }
 0x1eb   :  { %v3767_v12 = vpop.f32.mrb[8].mxu0 }
 0x1ec   :  { %v3769_v1 = vpop.f32.mrb[9].mxu0 }
 0x1ef   :  { %v3771_v44 = vpop.f32.mrb[10].mxu0 }
 0x1f0   :  { %v3773_v7 = vpop.f32.mrb[11].mxu0 }
 0x1f3   :  { %v3780_v55 = vpop.f32.mrb[12].mxu0 }
 0x1f4   :  { %v3782_v14 = vpop.f32.mrb[13].mxu0 }
 0x1f7   :  { %v3785_v33 = vpop.f32.mrb[14].mxu0 }
 0x1f8   :  { %v3787_v20 = vpop.f32.mrb[15].mxu0 }
 0x1fb   :  { %v3792_v18 = vpop.f32.mrb[16].mxu0 }
 0x1fc   :  { %v3794_v6 = vpop.f32.mrb[17].mxu0 }
 0x200   :  { %v930_v49 = vpop.f32.mrb[0].mxu1 }
 0x201   :  { %v2526_v30 = vadd.f32 %v930_v49, %v3790_v21  ;;  %v932_v15 = vpop.f32.mrb[1].mxu1 }
 0x203   :  { %v3804_v53 = vmax.f32 %v2526_v30, 0.0 }
 0x204   :  { %v935_v37 = vpop.f32.mrb[2].mxu1 }
 0x205   :  { %v2527_v22 = vadd.f32 %v935_v37, %v3790_v21  ;;  %v937_v60 = vpop.f32.mrb[3].mxu1  ;;  %v1063_v54 = vmul.f32 %v3804_v53, %v3804_v53  ;;  %v1026_v46 = vsel %vm1025_vm1, %v3804_v53, 0.0 }
 0x207   :  { %v3801_v48 = vmax.f32 %v2527_v22, 0.0  ;;  %v1079_v15 = vsel %vm1025_vm1, %v1063_v54, 0.0 }
 0x208   :  { %v940_v35 = vpop.f32.mrb[4].mxu1 }
 0x209   :  { %v2528_v11 = vadd.f32 %v940_v35, %v3790_v21  ;;  %v942_v26 = vpop.f32.mrb[5].mxu1  ;;  %v1064_v36 = vmul.f32 %v3801_v48, %v3801_v48  ;;  %v1027_v62 = vsel %vm1025_vm1, %v3801_v48, 0.0 }
 0x20a   :  { %v1028_v37 = vadd.f32 %v1027_v62, %v1026_v46  ;;  %v1645_v26 = vld [vmem:[#allocation11] sm:$0xff] }
 0x20b   :  { %v3806_v9 = vmax.f32 %v2528_v11, 0.0  ;;  %v1080_v43 = vsel %vm1025_vm1, %v1064_v36, 0.0 }
 0x20c   :  { %v945_v63 = vpop.f32.mrb[6].mxu1 }
 0x20d   :  { %v2529_v52 = vadd.f32 %v945_v63, %v3790_v21  ;;  %v947_v40 = vpop.f32.mrb[7].mxu1  ;;  %v1065_v31 = vmul.f32 %v3806_v9, %v3806_v9  ;;  %v1029_v23 = vsel %vm1025_vm1, %v3806_v9, 0.0  ;;  %v1646_v63 = vld [vmem:[#allocation11 + $0x8] sm:$0xff] }
 0x20e   :  { %v1030_v40 = vadd.f32 %v1029_v23, %v1028_v37 }
 0x20f   :  { %v3808_v19 = vmax.f32 %v2529_v52, 0.0  ;;  %v1082_v22 = vsel %vm1025_vm1, %v1065_v31, 0.0  ;;  %v1081_v52 = vadd.f32 %v1080_v43, %v1079_v15 }
 0x210   :  { %v950_v47 = vpop.f32.mrb[8].mxu1 }
 0x211   :  { %v2530_v51 = vadd.f32 %v950_v47, %v3790_v21  ;;  %v952_v59 = vpop.f32.mrb[9].mxu1  ;;  %v1066_v32 = vmul.f32 %v3808_v19, %v3808_v19  ;;  %v1031_v60 = vsel %vm1025_vm1, %v3808_v19, 0.0 }
 0x212   :  { %v3840_v59 = vpack.c.bf16 %v1646_v63, %v1645_v26 }
 0x213   :  { %v3819_v3 = vmax.f32 %v2530_v51, 0.0  ;;  %v1084_v47 = vsel %vm1025_vm1, %v1066_v32, 0.0 }
 0x214   :  { %v955_v24 = vpop.f32.mrb[10].mxu1  ;;  %2518 = vmatprep.subr.bf16.mxu0 %v3840_v59 }
 0x215   :  { %v2531_v50 = vadd.f32 %v955_v24, %v3790_v21  ;;  %v957_v5 = vpop.f32.mrb[11].mxu1  ;;  %v1067_v35 = vmul.f32 %v3819_v3, %v3819_v3  ;;  %v1033_v24 = vsel %vm1025_vm1, %v3819_v3, 0.0 }
 0x217   :  { %v3828_v13 = vmax.f32 %v2531_v50, 0.0  ;;  %v1086_v54 = vsel %vm1025_vm1, %v1067_v35, 0.0 }
 0x218   :  { %v960_v27 = vpop.f32.mrb[12].mxu1 }
 0x219   :  { %v2532_v39 = vadd.f32 %v960_v27, %v3790_v21  ;;  %v962_v56 = vpop.f32.mrb[13].mxu1  ;;  %v1068_v50 = vmul.f32 %v3828_v13, %v3828_v13  ;;  %v1035_v57 = vsel %vm1025_vm1, %v3828_v13, 0.0 }
 0x21a   :  { %v1032_v56 = vadd.f32 %v1031_v60, %v1030_v40 }
 0x21b   :  { %v3837_v11 = vmax.f32 %v2532_v39, 0.0  ;;  %v1083_v39 = vadd.f32 %v1082_v22, %v1081_v52  ;;  %v1088_v0 = vsel %vm1025_vm1, %v1068_v50, 0.0 }
 0x21c   :  { %v965_v42 = vpop.f32.mrb[14].mxu1  ;;  %v1034_v31 = vadd.f32 %v1033_v24, %v1032_v56 }
 0x21d   :  { %v2533_v49 = vadd.f32 %v965_v42, %v3790_v21  ;;  %v967_v30 = vpop.f32.mrb[15].mxu1  ;;  %v1069_v58 = vmul.f32 %v3837_v11, %v3837_v11  ;;  %v1085_v62 = vadd.f32 %v1084_v47, %v1083_v39  ;;  %v1037_v46 = vsel %vm1025_vm1, %v3837_v11, 0.0 }
 0x21e   :  { %v1036_v23 = vadd.f32 %v1035_v57, %v1034_v31 }
 0x21f   :  { %v3846_v5 = vmax.f32 %v2533_v49, 0.0  ;;  %v1087_v43 = vadd.f32 %v1086_v54, %v1085_v62  ;;  %v1090_v49 = vsel %vm1025_vm1, %v1069_v58, 0.0 }
 0x220   :  { %v970_v51 = vpop.f32.mrb[16].mxu1  ;;  %v1038_v60 = vadd.f32 %v1037_v46, %v1036_v23 }
 0x221   :  { %v2534_v27 = vadd.f32 %v970_v51, %v3790_v21  ;;  %v972_v36 = vpop.f32.mrb[17].mxu1  ;;  %v1070_v32 = vmul.f32 %v3846_v5, %v3846_v5  ;;  %v1039_v30 = vsel %vm1025_vm1, %v3846_v5, 0.0  ;;  %v1089_v22 = vadd.f32 %v1088_v0, %v1087_v43 }
 0x222   :  { %v1040_v24 = vadd.f32 %v1039_v30, %v1038_v60 }
 0x223   :  { %v3854_v38 = vmax.f32 %v2534_v27, 0.0  ;;  %v1092_v26 = vsel %vm1025_vm1, %v1070_v32, 0.0  ;;  %v1091_v51 = vadd.f32 %v1090_v49, %v1089_v22 }
 0x224   :  { %v975_v41 = vpop.f32.mrb[18].mxu1 }
 0x225   :  { %v2535_v42 = vadd.f32 %v975_v41, %v3790_v21  ;;  %v977_v10 = vpop.f32.mrb[19].mxu1  ;;  %v1071_v15 = vmul.f32 %v3854_v38, %v3854_v38  ;;  %v1041_v63 = vsel %vm1025_vm1, %v3854_v38, 0.0  ;;  %v1093_v39 = vadd.f32 %v1092_v26, %v1091_v51 }
 0x226   :  { %v1042_v56 = vadd.f32 %v1041_v63, %v1040_v24 }
 0x227   :  { %v3868_v37 = vmax.f32 %v2535_v42, 0.0  ;;  %v1094_v50 = vsel %vm1025_vm1, %v1071_v15, 0.0 }
 0x228   :  { %v980_v35 = vpop.f32.mrb[20].mxu1  ;;  %v1095_v0 = vadd.f32 %v1094_v50, %v1093_v39 }
 0x229   :  { %v1072_v52 = vmul.f32 %v3868_v37, %v3868_v37  ;;  %v2536_v40 = vadd.f32 %v980_v35, %v3790_v21  ;;  %v982_v47 = vpop.f32.mrb[21].mxu1  ;;  %v1043_v27 = vsel %vm1025_vm1, %v3868_v37, 0.0 }
 0x22a   :  { %v1044_v46 = vadd.f32 %v1043_v27, %v1042_v56 }
 0x22b   :  { %v3879_v36 = vmax.f32 %v2536_v40, 0.0  ;;  %v1096_v57 = vsel %vm1025_vm1, %v1072_v52, 0.0 }
 0x22c   :  { %v985_v54 = vpop.f32.mrb[22].mxu1  ;;  %v1097_v10 = vadd.f32 %v1096_v57, %v1095_v0 }
 0x22d   :  { %v1045_v58 = vsel %vm1025_vm1, %v3879_v36, 0.0  ;;  %v1073_v62 = vmul.f32 %v3879_v36, %v3879_v36  ;;  %v2537_v31 = vadd.f32 %v985_v54, %v3790_v21  ;;  %v987_v41 = vpop.f32.mrb[23].mxu1 }
 0x22e   :  { %v1046_v43 = vadd.f32 %v1045_v58, %v1044_v46 }
 0x22f   :  { %v1098_v32 = vsel %vm1025_vm1, %v1073_v62, 0.0  ;;  %v3888_v42 = vmax.f32 %v2537_v31, 0.0 }
 0x230   :  { %v990_v23 = vpop.f32.mrb[24].mxu1  ;;  %v1099_v60 = vadd.f32 %v1098_v32, %v1097_v10 }
 0x231   :  { %v1047_v49 = vsel %vm1025_vm1, %v3888_v42, 0.0  ;;  %v1074_v30 = vmul.f32 %v3888_v42, %v3888_v42  ;;  %v2538_v15 = vadd.f32 %v990_v23, %v3790_v21  ;;  %v992_v22 = vpop.f32.mrb[25].mxu1 }
 0x232   :  { %v1048_v35 = vadd.f32 %v1047_v49, %v1046_v43  ;;  %v1266_v22 = vrot.slane %v3778_v29, 3 }
 0x233   :  { %v1100_v26 = vsel %vm1025_vm1, %v1074_v30, 0.0  ;;  %v3896_v63 = vmax.f32 %v2538_v15, 0.0 }
 0x234   :  { %v1101_v52 = vadd.f32 %v1100_v26, %v1099_v60  ;;  %v995_v40 = vpop.f32.mrb[26].mxu1 }
 0x235   :  { %v1049_v47 = vsel %vm1025_vm1, %v3896_v63, 0.0  ;;  %v1075_v51 = vmul.f32 %v3896_v63, %v3896_v63  ;;  %v2539_v24 = vadd.f32 %v995_v40, %v3790_v21  ;;  %v997_v50 = vpop.f32.mrb[27].mxu1 }
 0x236   :  { %v1050_v27 = vadd.f32 %v1049_v47, %v1048_v35 }
 0x237   :  { %v1102_v39 = vsel %vm1025_vm1, %v1075_v51, 0.0  ;;  %v3904_v56 = vmax.f32 %v2539_v24, 0.0 }
 0x238   :  { %v1103_v54 = vadd.f32 %v1102_v39, %v1101_v52  ;;  %v1000_v57 = vpop.f32.mrb[28].mxu1 }
 0x239   :  { %v1051_v58 = vsel %vm1025_vm1, %v3904_v56, 0.0  ;;  %v1076_v62 = vmul.f32 %v3904_v56, %v3904_v56  ;;  %v2540_v31 = vadd.f32 %v1000_v57, %v3790_v21  ;;  %v1002_v41 = vpop.f32.mrb[29].mxu1 }
 0x23a   :  { %v1052_v0 = vadd.f32 %v1051_v58, %v1050_v27 }
 0x23b   :  { %v1104_v46 = vsel %vm1025_vm1, %v1076_v62, 0.0  ;;  %v3912_v32 = vmax.f32 %v2540_v31, 0.0 }
 0x23c   :  { %v1105_v10 = vadd.f32 %v1104_v46, %v1103_v54  ;;  %v1005_v43 = vpop.f32.mrb[30].mxu1 }
 0x23d   :  { %v1053_v23 = vsel %vm1025_vm1, %v3912_v32, 0.0  ;;  %v1077_v49 = vmul.f32 %v3912_v32, %v3912_v32  ;;  %v2541_v30 = vadd.f32 %v1005_v43, %v3790_v21  ;;  %v1007_v15 = vpop.f32.mrb[31].mxu1 }
 0x23e   :  { %v1054_v60 = vadd.f32 %v1053_v23, %v1052_v0 }
 0x23f   :  { %v1106_v35 = vsel %vm1025_vm1, %v1077_v49, 0.0  ;;  %v3921_v26 = vmax.f32 %v2541_v30, 0.0 }
 0x240   :  { %v1107_v52 = vadd.f32 %v1106_v35, %v1105_v10  ;;  %v1334_v40 = vpop.f32.mrb[32].mxu1 }
 0x241   :  { %v1055_v47 = vsel %vm1025_vm1, %v3921_v26, 0.0  ;;  %v1078_v51 = vmul.f32 %v3921_v26, %v3921_v26  ;;  %v1335_v24 = vadd.f32 %v1334_v40, %v1266_v22  ;;  %v2366_v50 = vpop.f32.mrb[33].mxu1 }
 0x242   :  { %v1056_v27 = vadd.f32 %v1055_v47, %v1054_v60 }
 0x243   :  { %v1108_v21 = vsel %vm1025_vm1, %v1078_v51, 0.0  ;;  %v3929_v39 = vrot.slane %v1335_v24, %v3641_v8 }
 0x244   :  { %v1057_v54 = vrot.slane %v1056_v27, 4  ;;  %v1109_v57 = vadd.f32 %v1108_v21, %v1107_v52 }
 0x245   :  { %v1464_v58 = vadd.f32 %v3780_v55, %v3929_v39  ;;  %v1409_v62 = vadd.f32 %v3757_v61, %v3929_v39  ;;  %v1414_v31 = vadd.f32 %v3755_v34, %v3929_v39  ;;  %v1419_v41 = vadd.f32 %v3761_v16, %v3929_v39 }
 0x246   :  { %v1058_v0 = vadd.f32 %v1057_v54, %v1056_v27  ;;  %v1110_v46 = vrot.slane %v1109_v57, 4  ;;  %v1424_v8 = vadd.f32 %v3759_v2, %v3929_v39  ;;  %v1429_v10 = vadd.f32 %v3765_v17, %v3929_v39 }
 0x247   :  { %v1434_v55 = vadd.f32 %v3763_v25, %v3929_v39  ;;  %v1439_v61 = vadd.f32 %v3769_v1, %v3929_v39  ;;  %v1444_v34 = vadd.f32 %v3767_v12, %v3929_v39  ;;  %v1449_v16 = vadd.f32 %v3773_v7, %v3929_v39 }
 0x248   :  { %v1059_v43 = vrot.slane %v1058_v0, 2  ;;  %v1111_v23 = vadd.f32 %v1110_v46, %v1109_v57  ;;  %v1454_v2 = vadd.f32 %v3771_v44, %v3929_v39  ;;  %v1459_v17 = vadd.f32 %v3782_v14, %v3929_v39 }
 0x249   :  { %v3955_v49 = vmax.f32 %v1409_v62, 0.0  ;;  %v3957_v15 = vmax.f32 %v1414_v31, 0.0  ;;  %v3959_v12 = vmax.f32 %v1419_v41, 0.0  ;;  %v3961_v60 = vmax.f32 %v1424_v8, 0.0 }
 0x24a   :  { %v1060_v25 = vadd.f32 %v1059_v43, %v1058_v0  ;;  %v1112_v30 = vrot.slane %v1111_v23, 2  ;;  %v3967_v52 = vmax.f32 %v1464_v58, 0.0  ;;  %v3971_v24 = vmax.f32 %v1429_v10, 0.0 }
 0x24b   :  { %v1503_v7 = vsel %vm1025_vm1, %v3955_v49, 0.0  ;;  %v1504_v14 = vsel %vm1025_vm1, %v3957_v15, 0.0  ;;  %v1506_v50 = vsel %vm1025_vm1, %v3959_v12, 0.0  ;;  %v3975_v27 = vmax.f32 %v1434_v55, 0.0 }
 0x24c   :  { %v1061_v1 = vrot.slane %v1060_v25, 1  ;;  %v1113_v22 = vadd.f32 %v1112_v30, %v1111_v23  ;;  %v1505_v40 = vadd.f32 %v1504_v14, %v1503_v7  ;;  %v1508_v54 = vsel %vm1025_vm1, %v3961_v60, 0.0 }
 0x24d   :  { %v1540_v62 = vmul.f32 %v3955_v49, %v3955_v49  ;;  %v1541_v31 = vmul.f32 %v3957_v15, %v3957_v15  ;;  %v1551_v41 = vmul.f32 %v3967_v52, %v3967_v52  ;;  %v3987_v8 = vmax.f32 %v1439_v61, 0.0 }
 0x24e   :  { %v1062_v35 = vadd.f32 %v1061_v1, %v1060_v25  ;;  %v1114_v44 = vrot.slane %v1113_v22, 1  ;;  %v1507_v21 = vadd.f32 %v1506_v50, %v1505_v40  ;;  %v1510_v10 = vsel %vm1025_vm1, %v3971_v24, 0.0 }
 0x24f   :  { %v1542_v55 = vmul.f32 %v3959_v12, %v3959_v12  ;;  %v3993_v43 = vmax.f32 %v1444_v34, 0.0  ;;  %v3995_v23 = vmax.f32 %v1449_v16, 0.0  ;;  %v1512_v30 = vsel %vm1025_vm1, %v3975_v27, 0.0 }
 0x250   :  { %v1115_v47 = vadd.f32 %v1114_v44, %v1113_v22  ;;  %v3969_v51 = vmul.f32 0.0078125, %v1062_v35  ;;  %v1509_v0 = vadd.f32 %v1508_v54, %v1507_v21  ;;  %v1543_v22 = vmul.f32 %v3961_v60, %v3961_v60 }
 0x251   :  { %v1556_v61 = vsel %vm1025_vm1, %v1540_v62, 0.0  ;;  %v1557_v7 = vsel %vm1025_vm1, %v1541_v31, 0.0  ;;  %v4003_v35 = vmax.f32 %v1454_v2, 0.0  ;;  %v4005_v44 = vmax.f32 %v1459_v17, 0.0 }
 0x252   :  { %v1117_v57 = vmul.f32 0.0078125, %v1115_v47  ;;  %v1118_v58 = vmul.f32 %v3969_v51, %v3969_v51  ;;  %v1511_v25 = vadd.f32 %v1510_v10, %v1509_v0  ;;  %v1558_v14 = vadd.f32 %v1557_v7, %v1556_v61 }
 0x253   :  { %v1514_v16 = vsel %vm1025_vm1, %v3987_v8, 0.0  ;;  %v1544_v40 = vmul.f32 %v3971_v24, %v3971_v24  ;;  %v1559_v47 = vsel %vm1025_vm1, %v1542_v55, 0.0  ;;  %v1516_v21 = vsel %vm1025_vm1, %v3993_v43, 0.0 }
 0x254   :  { %v1119_v46 = vsub.f32 %v1117_v57, %v1118_v58  ;;  %v1513_v34 = vadd.f32 %v1512_v30, %v1511_v25  ;;  %v1545_v2 = vmul.f32 %v3975_v27, %v3975_v27  ;;  %v1560_v17 = vadd.f32 %v1559_v47, %v1558_v14 }
 0x255   :  { %v1561_v54 = vsel %vm1025_vm1, %v1543_v22, 0.0  ;;  %v1474_v57 = vadd.f32 %v3785_v33, %v3929_v39  ;;  %v1469_v58 = vadd.f32 %v3787_v20, %v3929_v39  ;;  %v1484_v62 = vadd.f32 %v3792_v18, %v3929_v39 }
 0x256   :  { %v1120_v1 = vadd.f32 1e-05, %v1119_v46  ;;  %v1515_v50 = vadd.f32 %v1514_v16, %v1513_v34  ;;  %v1518_v0 = vsel %vm1025_vm1, %v3995_v23, 0.0  ;;  %v1562_v46 = vadd.f32 %v1561_v54, %v1560_v17 }
 0x257   :  { %v1479_v10 = vadd.f32 %v3794_v6, %v3929_v39  ;;  %v1520_v55 = vsel %vm1025_vm1, %v4003_v35, 0.0  ;;  %v1546_v33 = vmul.f32 %v3987_v8, %v3987_v8  ;;  %v1547_v20 = vmul.f32 %v3993_v43, %v3993_v43 }
 0x258   :  { %2617 = vrsqrt.f32 %v1120_v1  ;;  %v1517_v31 = vadd.f32 %v1516_v21, %v1515_v50  ;;  %v1563_v25 = vsel %vm1025_vm1, %v1544_v40, 0.0  ;;  %v1548_v30 = vmul.f32 %v3995_v23, %v3995_v23 }
 0x259   :  { %v1549_v1 = vmul.f32 %v4003_v35, %v4003_v35  ;;  %v1564_v22 = vadd.f32 %v1563_v25, %v1562_v46  ;;  %v1565_v6 = vsel %vm1025_vm1, %v1545_v2, 0.0  ;;  %v4039_v39 = vmax.f32 %v1474_v57, 0.0 }
 0x25a   :  { %v1519_v18 = vadd.f32 %v1518_v0, %v1517_v31  ;;  %v4041_v61 = vmax.f32 %v1469_v58, 0.0  ;;  %v4043_v7 = vmax.f32 %v1479_v10, 0.0  ;;  %v1524_v34 = vsel %vm1025_vm1, %v3967_v52, 0.0 }
 0x25b   :  { %v1550_v16 = vmul.f32 %v4005_v44, %v4005_v44  ;;  %v1566_v40 = vadd.f32 %v1565_v6, %v1564_v22  ;;  %v1577_v47 = vsel %vm1025_vm1, %v1551_v41, 0.0  ;;  %v1522_v50 = vsel %vm1025_vm1, %v4005_v44, 0.0 }
 0x25c   :  { %v1521_v14 = vadd.f32 %v1520_v55, %v1519_v18  ;;  %v1567_v21 = vsel %vm1025_vm1, %v1546_v33, 0.0  ;;  %v4053_v2 = vmax.f32 %v1484_v62, 0.0  ;;  %v1569_v57 = vsel %vm1025_vm1, %v1547_v20, 0.0 }
 0x25d   :  { %v1568_v54 = vadd.f32 %v1567_v21, %v1566_v40  ;;  %v1571_v58 = vsel %vm1025_vm1, %v1548_v30, 0.0  ;;  %v1573_v0 = vsel %vm1025_vm1, %v1549_v1, 0.0  ;;  %v1553_v46 = vmul.f32 %v4039_v39, %v4039_v39 }
 0x25e   :  { %v1523_v17 = vadd.f32 %v1522_v50, %v1521_v14  ;;  %v1552_v41 = vmul.f32 %v4041_v61, %v4041_v61  ;;  %v1554_v10 = vmul.f32 %v4043_v7, %v4043_v7  ;;  %v1575_v33 = vsel %vm1025_vm1, %v1550_v16, 0.0 }
 0x25f   :  { %v1570_v55 = vadd.f32 %v1569_v57, %v1568_v54  ;;  %v1528_v25 = vsel %vm1025_vm1, %v4039_v39, 0.0  ;;  %v1526_v18 = vsel %vm1025_vm1, %v4041_v61, 0.0  ;;  %v1532_v30 = vsel %vm1025_vm1, %v4053_v2, 0.0 }
 0x260   :  { %v1525_v20 = vadd.f32 %v1524_v34, %v1523_v17  ;;  %v1555_v1 = vmul.f32 %v4053_v2, %v4053_v2  ;;  %v1581_v34 = vsel %vm1025_vm1, %v1553_v46, 0.0  ;;  %v1579_v16 = vsel %vm1025_vm1, %v1552_v41, 0.0 }
 0x261   :  { %v1572_v14 = vadd.f32 %v1571_v58, %v1570_v55  ;;  %v1530_v50 = vsel %vm1025_vm1, %v4043_v7, 0.0  ;;  %v1583_v21 = vsel %vm1025_vm1, %v1554_v10, 0.0 }
 0x262   :  { %v2618_v31 = vpop.eup %2617  ;;  %v1527_v40 = vadd.f32 %v1526_v18, %v1525_v20 }
 0x263   :  { %v1122_v62 = vmul.f32 %v2618_v31, %v3778_v29  ;;  %v1574_v57 = vadd.f32 %v1573_v0, %v1572_v14 }
 0x264   :  { %v1529_v31 = vadd.f32 %v1528_v25, %v1527_v40 }
 0x265   :  { %v1126_v22 = vrot.slane %v1122_v62, %v3638_v4  ;;  %v1143_v6 = vmul.f32 %v1122_v62, %v3969_v51  ;;  %v1576_v62 = vadd.f32 %v1575_v33, %v1574_v57 }
 0x266   :  { %v1531_v55 = vadd.f32 %v1530_v50, %v1529_v31 }
 0x267   :  { %v1142_v17 = vmul.f32 %v1126_v22, %v3921_v26  ;;  %v1145_v54 = vrot.slane %v1143_v6, 7  ;;  %v1127_v4 = vmul.f32 %v1126_v22, %v3804_v53  ;;  %v1128_v51 = vmul.f32 %v1126_v22, %v3801_v48 }
 0x268   :  { %v1129_v58 = vmul.f32 %v1126_v22, %v3806_v9  ;;  %v1130_v46 = vmul.f32 %v1126_v22, %v3808_v19  ;;  %v1131_v20 = vmul.f32 %v1126_v22, %v3819_v3  ;;  %v1132_v10 = vmul.f32 %v1126_v22, %v3828_v13 }
 0x269   :  { %v1147_v41 = vsub.f32 %v3778_v29, %v1145_v54  ;;  %v1133_v26 = vmul.f32 %v1126_v22, %v3837_v11  ;;  %v1134_v0 = vmul.f32 %v1126_v22, %v3846_v5  ;;  %v1135_v53 = vmul.f32 %v1126_v22, %v3854_v38 }
 0x26a   :  { %v1578_v25 = vadd.f32 %v1577_v47, %v1576_v62  ;;  %v1533_v9 = vadd.f32 %v1532_v30, %v1531_v55  ;;  %v1136_v19 = vmul.f32 %v1126_v22, %v3868_v37  ;;  %v1137_v18 = vmul.f32 %v1126_v22, %v3879_v36 }
 0x26b   :  { %v1151_v48 = vrot.slane %v1147_v41, %v3647_v28  ;;  %v1138_v33 = vmul.f32 %v1126_v22, %v3888_v42  ;;  %v1139_v3 = vmul.f32 %v1126_v22, %v3896_v63  ;;  %v1140_v13 = vmul.f32 %v1126_v22, %v3904_v56 }
 0x26c   :  { %v1580_v6 = vadd.f32 %v1579_v16, %v1578_v25  ;;  %v1534_v11 = vrot.slane %v1533_v9, 4 }
 0x26d   :  { %v4098_v14 = vadd.f32 %v1151_v48, %v1127_v4  ;;  %v4100_v5 = vadd.f32 %v1151_v48, %v1128_v51  ;;  %v4102_v38 = vadd.f32 %v1151_v48, %v1129_v58  ;;  %v4104_v28 = vadd.f32 %v1151_v48, %v1130_v46 }
 0x26e   :  { %v4106_v47 = vadd.f32 %v1151_v48, %v1131_v20  ;;  %v4108_v37 = vadd.f32 %v1151_v48, %v1132_v10  ;;  %v1535_v36 = vadd.f32 %v1534_v11, %v1533_v9  ;;  %v1582_v42 = vadd.f32 %v1581_v34, %v1580_v6  ;;  %v1648_v6 = vld [vmem:[#allocation11 + $0x18] sm:$0xff] }
 0x26f   :  { %v4110_v30 = vadd.f32 %v1151_v48, %v1133_v26  ;;  %v4112_v63 = vadd.f32 %v1151_v48, %v1134_v0  ;;  %v4114_v56 = vadd.f32 %v1151_v48, %v1135_v53  ;;  %v4116_v40 = vadd.f32 %v1151_v48, %v1136_v19 }
 0x270   :  { %v4118_v16 = vadd.f32 %v1151_v48, %v1137_v18  ;;  %v4120_v50 = vadd.f32 %v1151_v48, %v1138_v33  ;;  %v1536_v54 = vrot.slane %v1535_v36, 2  ;;  %v1584_v57 = vadd.f32 %v1583_v21, %v1582_v42 }
 0x271   :  { %v4122_v31 = vadd.f32 %v1151_v48, %v1139_v3  ;;  %v4124_v4 = vadd.f32 %v1151_v48, %v1140_v13  ;;  %v1585_v34 = vsel %vm1025_vm1, %v1555_v1, 0.0  ;;  %v1141_v51 = vmul.f32 %v1126_v22, %v3912_v32  ;;  %v1647_v13 = vld [vmem:[#allocation11 + $0x10] sm:$0xff] }
 0x272   :  { %v4128_v58 = vadd.f32 %v1151_v48, %v1142_v17  ;;  %v1537_v46 = vadd.f32 %v1536_v54, %v1535_v36  ;;  %v1586_v41 = vadd.f32 %v1585_v34, %v1584_v57  ;;  %v1602_v32 = vsub.s32 4, %v3625_v45 }
 0x273   :  { %v4130_v62 = vadd.f32 %v1151_v48, %v1141_v51  ;;  %v1627_v42 = vsub.s32 5, %v3625_v45  ;;  %v2521_v57 = vpack.c.bf16 %v1648_v6, %v1647_v13 }
 0x274   :  { %v1538_v55 = vrot.slane %v1537_v46, 1  ;;  %v1587_v20 = vrot.slane %v1586_v41, 4 }
 0x276   :  { %v1539_v10 = vadd.f32 %v1538_v55, %v1537_v46  ;;  %v1588_v26 = vadd.f32 %v1587_v20, %v1586_v41 }
 0x278   :  { %v1589_v0 = vrot.slane %v1588_v26, 2  ;;  %v1593_v53 = vmul.f32 0.0078125, %v1539_v10 }
 0x27a   :  { %v1590_v21 = vadd.f32 %v1589_v0, %v1588_v26  ;;  %v1595_v19 = vmul.f32 %v1593_v53, %v1593_v53 }
 0x27c   :  { %v1591_v25 = vrot.slane %v1590_v21, 1 }
 0x27e   :  { %v1592_v9 = vadd.f32 %v1591_v25, %v1590_v21 }
 0x280   :  { %v1594_v18 = vmul.f32 0.0078125, %v1592_v9 }
 0x282   :  { %v1596_v1 = vsub.f32 %v1594_v18, %v1595_v19 }
 0x284   :  { %v1597_v33 = vadd.f32 1e-05, %v1596_v1 }
 0x286   :  { %2619 = vrsqrt.f32 %v1597_v33 }
 0x290   :  { %v2620_v22 = vpop.eup %2619 }
 0x291   :  { %v1599_v17 = vmul.f32 %v2620_v22, %v3778_v29 }
 0x293   :  { %v1603_v48 = vrot.slane %v1599_v17, %v1602_v32  ;;  %v1620_v3 = vmul.f32 %v1599_v17, %v1593_v53 }
 0x295   :  { %v1618_v11 = vmul.f32 %v1603_v48, %v4043_v7  ;;  %v1622_v36 = vrot.slane %v1620_v3, 7  ;;  %v1604_v54 = vmul.f32 %v1603_v48, %v3955_v49  ;;  %v1605_v51 = vmul.f32 %v1603_v48, %v3957_v15 }
 0x296   :  { %v1606_v46 = vmul.f32 %v1603_v48, %v3959_v12  ;;  %v1607_v41 = vmul.f32 %v1603_v48, %v3961_v60  ;;  %v1608_v55 = vmul.f32 %v1603_v48, %v3971_v24  ;;  %v1609_v20 = vmul.f32 %v1603_v48, %v3975_v27 }
 0x297   :  { %v1624_v34 = vsub.f32 %v3778_v29, %v1622_v36  ;;  %v1610_v7 = vmul.f32 %v1603_v48, %v3987_v8  ;;  %v1616_v10 = vmul.f32 %v1603_v48, %v4041_v61  ;;  %v1611_v49 = vmul.f32 %v1603_v48, %v3993_v43 }
 0x298   :  { %v1617_v26 = vmul.f32 %v1603_v48, %v4039_v39  ;;  %v1619_v29 = vmul.f32 %v1603_v48, %v4053_v2  ;;  %v1612_v15 = vmul.f32 %v1603_v48, %v3995_v23  ;;  %v1613_v12 = vmul.f32 %v1603_v48, %v4003_v35 }
 0x299   :  { %v1628_v45 = vrot.slane %v1624_v34, %v1627_v42  ;;  %v1614_v60 = vmul.f32 %v1603_v48, %v4005_v44  ;;  %v1615_v24 = vmul.f32 %v1603_v48, %v3967_v52 }
 0x29b   :  { %v1629_v27 = vadd.f32 %v1628_v45, %v1604_v54  ;;  %v1630_v0 = vadd.f32 %v1628_v45, %v1605_v51  ;;  %v1631_v8 = vadd.f32 %v1628_v45, %v1606_v46  ;;  %v1632_v21 = vadd.f32 %v1628_v45, %v1607_v41 }
 0x29c   :  { %v1633_v61 = vadd.f32 %v1628_v45, %v1608_v55  ;;  %v1634_v53 = vadd.f32 %v1628_v45, %v1609_v20  ;;  %v1635_v25 = vadd.f32 %v1628_v45, %v1610_v7  ;;  %v1636_v43 = vadd.f32 %v1628_v45, %v1611_v49 }
 0x29d   :  { %2407 = vmatprep.mubr.msk.f32.mxu0 %vm1025_vm1, %v1629_v27  ;;  %v1637_v39 = vadd.f32 %v1628_v45, %v1612_v15  ;;  %v1638_v2 = vadd.f32 %v1628_v45, %v1613_v12  ;;  %v1639_v9 = vadd.f32 %v1628_v45, %v1614_v60  ;;  %v1640_v23 = vadd.f32 %v1628_v45, %v1615_v24 }
 0x29e   :  { %2408 = vmatmul.mubr.msk.f32.vlgmr.msra.gmra.mrb[18].mxu0 %vm1025_vm1, %v1630_v0  ;;  %v1641_v35 = vadd.f32 %v1628_v45, %v1616_v10  ;;  %v1642_v44 = vadd.f32 %v1628_v45, %v1617_v26  ;;  %v1643_v19 = vadd.f32 %v1628_v45, %v1618_v11  ;;  %v1644_v52 = vadd.f32 %v1628_v45, %v1619_v29 }
 0x29f   :  { %2410 = vmatprep.mubr.msk.f32.mxu0 %vm1025_vm1, %v1631_v8  ;;  %2520 = vmatpush3.bf16.msra.mxu0 %v3840_v59  ;;  %v2290_v59 = vld [vmem:[%s4311_s8] ss:$0 sm:$0xff]  ;;  %s2888_s8 = smov [#allocation13]  }
 0x2a0   :  { %2522 = vmatprep.subr.bf16.mxu0 %v2521_v57  ;;  %s2243_s25 = sshll.u32 %s2888_s8, 4  ;;  %s2244_s25 = int_to_ptr.vmem [resolvable:$true] %s2243_s25 }
 0x2a1   :  { %s2842_s27 = scalar_lea.vmem %s2244_s25, 2048  ;;  %p2847_p7 = scmp.lt.s32.totalorder %s2244_s25, %s2244_s25 }
 0x2a2   :  { %2411 = vmatmul.mubr.msk.f32.gmra.mrb[20].mxu0 %vm1025_vm1, %v1632_v21  ;;  %p2843_p6 = scmp.ne.s32.totalorder %s2244_s25, %s2842_s27  ;;  %p2848_p8 = scmp.lt.s32.totalorder %s2842_s27, %s2842_s27 }
 0x2a3   :  { %2413 = vmatprep.mubr.msk.f32.mxu0 %vm1025_vm1, %v1633_v61  ;;  %2524 = vmatpush3.bf16.msra.mxu0 %v2521_v57 }
 0x2a4   :  { %p2849_p9 = por %p2848_p8, %p2847_p7 }
 0x2a6   :  { %2414 = vmatmul.mubr.msk.f32.gmra.mrb[22].mxu0 %vm1025_vm1, %v1634_v53  ;;  %p2850_p10 = pnand %p2849_p9, %p2843_p6 }
 0x2a7   :  { %2416 = vmatprep.mubr.msk.f32.mxu0 %vm1025_vm1, %v1635_v25 }
 0x2aa   :  { %2417 = vmatmul.mubr.msk.f32.gmra.mrb[24].mxu0 %vm1025_vm1, %v1636_v43 }
 0x2ab   :  { %2419 = vmatprep.mubr.msk.f32.mxu0 %vm1025_vm1, %v1637_v39 }
 0x2ae   :  { %2420 = vmatmul.mubr.msk.f32.gmra.mrb[26].mxu0 %vm1025_vm1, %v1638_v2 }
 0x2af   :  { %2422 = vmatprep.mubr.msk.f32.mxu0 %vm1025_vm1, %v1639_v9 }
 0x2b2   :  { %2423 = vmatmul.mubr.msk.f32.gmra.mrb[28].mxu0 %vm1025_vm1, %v1640_v23 }
 0x2b3   :  { %2425 = vmatprep.mubr.msk.f32.mxu0 %vm1025_vm1, %v1641_v35 }
 0x2b6   :  { %2426 = vmatmul.mubr.msk.f32.gmra.mrb[30].mxu0 %vm1025_vm1, %v1642_v44 }
 0x2b7   :  { %2428 = vmatprep.mubr.msk.f32.mxu0 %vm1025_vm1, %v1643_v19 }
 0x2ba   :  { %2429 = vmatmul.mubr.msk.f32.gmra.mrb[32].mxu0 %vm1025_vm1, %v1644_v52 }
 0x2bb   :  { %2439 = vmatprep.mubr.msk.f32.mxu0 %vm1025_vm1, %v4098_v14 }
 0x2be   :  { %2440 = vmatmul.mubr.msk.f32.vlgmr.msra.gmra.mrb[18].mxu0 %vm1025_vm1, %v4100_v5 }
 0x2bf   :  { %2442 = vmatprep.mubr.msk.f32.mxu0 %vm1025_vm1, %v4102_v38 }
 0x2c2   :  { %2443 = vmatmul.mubr.msk.f32.gmra.mrb[20].mxu0 %vm1025_vm1, %v4104_v28 }
 0x2c3   :  { %2445 = vmatprep.mubr.msk.f32.mxu0 %vm1025_vm1, %v4106_v47 }
 0x2c6   :  { %2446 = vmatmul.mubr.msk.f32.gmra.mrb[22].mxu0 %vm1025_vm1, %v4108_v37 }
 0x2c7   :  { %2448 = vmatprep.mubr.msk.f32.mxu0 %vm1025_vm1, %v4110_v30 }
 0x2ca   :  { %2449 = vmatmul.mubr.msk.f32.gmra.mrb[24].mxu0 %vm1025_vm1, %v4112_v63 }
 0x2cb   :  { %2451 = vmatprep.mubr.msk.f32.mxu0 %vm1025_vm1, %v4114_v56 }
 0x2ce   :  { %2452 = vmatmul.mubr.msk.f32.gmra.mrb[26].mxu0 %vm1025_vm1, %v4116_v40 }
 0x2cf   :  { %2454 = vmatprep.mubr.msk.f32.mxu0 %vm1025_vm1, %v4118_v16 }
 0x2d2   :  { %2455 = vmatmul.mubr.msk.f32.gmra.mrb[28].mxu0 %vm1025_vm1, %v4120_v50 }
 0x2d3   :  { %2457 = vmatprep.mubr.msk.f32.mxu0 %vm1025_vm1, %v4122_v31 }
 0x2d6   :  { %2458 = vmatmul.mubr.msk.f32.gmra.mrb[30].mxu0 %vm1025_vm1, %v4124_v4 }
 0x2d7   :  { %2460 = vmatprep.mubr.msk.f32.mxu0 %vm1025_vm1, %v4130_v62 }
 0x2da   :  { %2461 = vmatmul.mubr.msk.f32.gmra.mrb[32].mxu0 %vm1025_vm1, %v4128_v58 }
 0x391   :  { %v2441_v14 = vpop.f32.mrb[18].mxu0 }
 0x392   :  { %v2047_v5 = vadd.f32 %v2441_v14, %v2290_v59  ;;  %v1960_v38 = vpop.f32.mrb[19].mxu0 }
 0x393   :  { %v2046_v47 = vadd.f32 %v2290_v59, %v1960_v38 }
 0x394   :  { %2064 = vmax.xlane.f32.xlu0 %v2047_v5 }
 0x395   :  { %v2444_v28 = vpop.f32.mrb[20].mxu0 }
 0x396   :  { %v2049_v37 = vadd.f32 %v2444_v28, %v2290_v59  ;;  %v1970_v30 = vpop.f32.mrb[21].mxu0 }
 0x397   :  { %v2048_v56 = vadd.f32 %v2290_v59, %v1970_v30 }
 0x398   :  { %2062 = vmax.xlane.f32.xlu0 %v2046_v47  ;;  %2068 = vmax.xlane.f32.xlu1 %v2049_v37 }
 0x399   :  { %v2447_v63 = vpop.f32.mrb[22].mxu0 }
 0x39a   :  { %v1980_v40 = vpop.f32.mrb[23].mxu0  ;;  %v2051_v31 = vadd.f32 %v2447_v63, %v2290_v59 }
 0x39b   :  { %v2050_v16 = vadd.f32 %v2290_v59, %v1980_v40 }
 0x39c   :  { %2066 = vmax.xlane.f32.xlu1 %v2048_v56 }
 0x39d   :  { %2070 = vmax.xlane.f32.xlu0 %v2050_v16  ;;  %v2450_v50 = vpop.f32.mrb[24].mxu0 }
 0x39e   :  { %v1990_v4 = vpop.f32.mrb[25].mxu0  ;;  %v2053_v18 = vadd.f32 %v2450_v50, %v2290_v59 }
 0x39f   :  { %v2052_v58 = vadd.f32 %v2290_v59, %v1990_v4 }
 0x3a0   :  { %2072 = vmax.xlane.f32.xlu1 %v2051_v31 }
 0x3a1   :  { %2074 = vmax.xlane.f32.xlu0 %v2052_v58  ;;  %v2453_v62 = vpop.f32.mrb[26].mxu0 }
 0x3a2   :  { %v2000_v1 = vpop.f32.mrb[27].mxu0  ;;  %v2055_v22 = vadd.f32 %v2453_v62, %v2290_v59 }
 0x3a3   :  { %v2054_v33 = vadd.f32 %v2290_v59, %v2000_v1 }
 0x3a4   :  { %2076 = vmax.xlane.f32.xlu1 %v2053_v18 }
 0x3a5   :  { %2078 = vmax.xlane.f32.xlu0 %v2054_v33  ;;  %v2456_v32 = vpop.f32.mrb[28].mxu0 }
 0x3a6   :  { %v2010_v17 = vpop.f32.mrb[29].mxu0  ;;  %v4204_v13 = vadd.f32 %v2456_v32, %v2290_v59 }
 0x3a7   :  { %v2056_v48 = vadd.f32 %v2290_v59, %v2010_v17 }
 0x3a8   :  { %2080 = vmax.xlane.f32.xlu1 %v2055_v22 }
 0x3a9   :  { %2082 = vmax.xlane.f32.xlu0 %v2056_v48  ;;  %v2459_v3 = vpop.f32.mrb[30].mxu0 }
 0x3aa   :  { %v2020_v6 = vpop.f32.mrb[31].mxu0  ;;  %v4210_v42 = vadd.f32 %v2459_v3, %v2290_v59 }
 0x3ab   :  { %v4206_v11 = vadd.f32 %v2290_v59, %v2020_v6 }
 0x3ac   :  { %2084 = vmax.xlane.f32.xlu1 %v4204_v13 }
 0x3ad   :  { %2086 = vmax.xlane.f32.xlu0 %v4206_v11  ;;  %v2462_v36 = vpop.f32.mrb[32].mxu0 }
 0x3ae   :  { %v2030_v54 = vpop.f32.mrb[33].mxu0  ;;  %v4216_v34 = vadd.f32 %v2462_v36, %v2290_v59 }
 0x3af   :  { %v4212_v57 = vadd.f32 %v2290_v59, %v2030_v54 }
 0x3b0   :  { %2088 = vmax.xlane.f32.xlu1 %v4210_v42 }
 0x3b1   :  { %2090 = vmax.xlane.f32.xlu0 %v4212_v57 }
 0x3b4   :  { %2092 = vmax.xlane.f32.xlu1 %v4216_v34 }
 0x421   :  { %v2065_v51 = vpop.xlane.xlu0 %2064 }
 0x422   :  { %v4219_v46 = vsub.f32 %v2047_v5, %v2065_v51 }
 0x424   :  { %v2112_v41 = vmul.f32 1.442695, %v4219_v46 }
 0x425   :  { %v2063_v55 = vpop.xlane.xlu0 %2062  ;;  %v2069_v20 = vpop.xlane.xlu1 %2068 }
 0x426   :  { %2621 = vpow2.f32 %v2112_v41  ;;  %v4222_v7 = vsub.f32 %v2046_v47, %v2063_v55  ;;  %v4224_v10 = vsub.f32 %v2049_v37, %v2069_v20 }
 0x428   :  { %v2110_v45 = vmul.f32 1.442695, %v4222_v7  ;;  %v2116_v49 = vmul.f32 1.442695, %v4224_v10 }
 0x429   :  { %v2067_v26 = vpop.xlane.xlu1 %2066 }
 0x42a   :  { %2623 = vpow2.f32 %v2110_v45  ;;  %v4228_v29 = vsub.f32 %v2048_v56, %v2067_v26  ;;  %v2071_v15 = vpop.xlane.xlu0 %2070 }
 0x42b   :  { %2625 = vpow2.f32 %v2116_v49  ;;  %v4230_v12 = vsub.f32 %v2050_v16, %v2071_v15 }
 0x42c   :  { %v2114_v60 = vmul.f32 1.442695, %v4228_v29 }
 0x42d   :  { %v2118_v24 = vmul.f32 1.442695, %v4230_v12  ;;  %v2073_v27 = vpop.xlane.xlu1 %2072 }
 0x42e   :  { %2627 = vpow2.f32 %v2114_v60  ;;  %v4234_v0 = vsub.f32 %v2051_v31, %v2073_v27  ;;  %v2075_v8 = vpop.xlane.xlu0 %2074 }
 0x42f   :  { %v4236_v21 = vsub.f32 %v2052_v58, %v2075_v8  ;;  %2629 = vpow2.f32 %v2118_v24 }
 0x430   :  { %v2622_v61 = vpop.eup %2621  ;;  %v2120_v53 = vmul.f32 1.442695, %v4234_v0 }
 0x431   :  { %v2122_v25 = vmul.f32 1.442695, %v4236_v21  ;;  %v2077_v43 = vpop.xlane.xlu1 %2076  ;;  %2144 = vadd.xlane.f32.xlu1 %v2622_v61 }
 0x432   :  { %2631 = vpow2.f32 %v2120_v53  ;;  %v4240_v39 = vsub.f32 %v2053_v18, %v2077_v43  ;;  %v2079_v2 = vpop.xlane.xlu0 %2078 }
 0x433   :  { %v4242_v9 = vsub.f32 %v2054_v33, %v2079_v2  ;;  %2633 = vpow2.f32 %v2122_v25 }
 0x434   :  { %v2624_v23 = vpop.eup %2623  ;;  %v2124_v35 = vmul.f32 1.442695, %v4240_v39 }
 0x435   :  { %v2626_v44 = vpop.eup %2625  ;;  %v2126_v19 = vmul.f32 1.442695, %v4242_v9  ;;  %v2081_v52 = vpop.xlane.xlu1 %2080  ;;  %2142 = vadd.xlane.f32.xlu0 %v2624_v23 }
 0x436   :  { %2635 = vpow2.f32 %v2124_v35  ;;  %v4246_v59 = vsub.f32 %v2055_v22, %v2081_v52  ;;  %2148 = vadd.xlane.f32.xlu1 %v2626_v44  ;;  %v2083_v14 = vpop.xlane.xlu0 %2082 }
 0x437   :  { %v4248_v5 = vsub.f32 %v2056_v48, %v2083_v14  ;;  %2637 = vpow2.f32 %v2126_v19 }
 0x438   :  { %v2628_v38 = vpop.eup %2627  ;;  %v2128_v28 = vmul.f32 1.442695, %v4246_v59 }
 0x439   :  { %v2130_v47 = vmul.f32 1.442695, %v4248_v5  ;;  %v2085_v37 = vpop.xlane.xlu1 %2084  ;;  %2146 = vadd.xlane.f32.xlu0 %v2628_v38  ;;  %v2630_v56 = vpop.eup %2629 }
 0x43a   :  { %2639 = vpow2.f32 %v2128_v28  ;;  %v4253_v30 = vsub.f32 %v4204_v13, %v2085_v37  ;;  %v2087_v63 = vpop.xlane.xlu0 %2086 }
 0x43b   :  { %v4256_v40 = vsub.f32 %v4206_v11, %v2087_v63  ;;  %2641 = vpow2.f32 %v2130_v47 }
 0x43c   :  { %v2632_v16 = vpop.eup %2631  ;;  %v2132_v50 = vmul.f32 1.442695, %v4253_v30 }
 0x43d   :  { %v2134_v31 = vmul.f32 1.442695, %v4256_v40  ;;  %v2089_v4 = vpop.xlane.xlu1 %2088  ;;  %2152 = vadd.xlane.f32.xlu1 %v2632_v16  ;;  %2150 = vadd.xlane.f32.xlu0 %v2630_v56  ;;  %v2634_v18 = vpop.eup %2633 }
 0x43e   :  { %2643 = vpow2.f32 %v2132_v50  ;;  %v4261_v58 = vsub.f32 %v4210_v42, %v2089_v4  ;;  %v2091_v62 = vpop.xlane.xlu0 %2090 }
 0x43f   :  { %v4264_v1 = vsub.f32 %v4212_v57, %v2091_v62  ;;  %2645 = vpow2.f32 %v2134_v31 }
 0x440   :  { %v2636_v33 = vpop.eup %2635  ;;  %v2136_v32 = vmul.f32 1.442695, %v4261_v58 }
 0x441   :  { %v2138_v22 = vmul.f32 1.442695, %v4264_v1  ;;  %2156 = vadd.xlane.f32.xlu1 %v2636_v33  ;;  %v2093_v17 = vpop.xlane.xlu1 %2092  ;;  %2154 = vadd.xlane.f32.xlu0 %v2634_v18  ;;  %v2638_v3 = vpop.eup %2637 }
 0x442   :  { %2647 = vpow2.f32 %v2136_v32  ;;  %v4269_v48 = vsub.f32 %v4216_v34, %v2093_v17 }
 0x443   :  { %2649 = vpow2.f32 %v2138_v22 }
 0x444   :  { %v2640_v13 = vpop.eup %2639  ;;  %v2140_v6 = vmul.f32 1.442695, %v4269_v48 }
 0x445   :  { %2160 = vadd.xlane.f32.xlu1 %v2640_v13  ;;  %2158 = vadd.xlane.f32.xlu0 %v2638_v3  ;;  %v2642_v11 = vpop.eup %2641 }
 0x446   :  { %2651 = vpow2.f32 %v2140_v6 }
 0x448   :  { %v2644_v36 = vpop.eup %2643 }
 0x449   :  { %2164 = vadd.xlane.f32.xlu1 %v2644_v36  ;;  %2162 = vadd.xlane.f32.xlu0 %v2642_v11  ;;  %v2646_v42 = vpop.eup %2645 }
 0x44c   :  { %v2648_v54 = vpop.eup %2647 }
 0x44d   :  { %2168 = vadd.xlane.f32.xlu1 %v2648_v54  ;;  %2166 = vadd.xlane.f32.xlu0 %v2646_v42  ;;  %v2650_v57 = vpop.eup %2649 }
 0x450   :  { %v2652_v51 = vpop.eup %2651 }
 0x451   :  { %2172 = vadd.xlane.f32.xlu1 %v2652_v51  ;;  %2170 = vadd.xlane.f32.xlu0 %v2650_v57 }
 0x4be   :  { %v2145_v34 = vpop.xlane.xlu1 %2144 }
 0x4bf   :  { %2653 = vlog2.f32 %v2145_v34 }
 0x4c2   :  { %v2143_v41 = vpop.xlane.xlu0 %2142 }
 0x4c3   :  { %v2149_v55 = vpop.xlane.xlu1 %2148  ;;  %2655 = vlog2.f32 %v2143_v41 }
 0x4c4   :  { %2657 = vlog2.f32 %v2149_v55 }
 0x4c6   :  { %v2147_v20 = vpop.xlane.xlu0 %2146 }
 0x4c7   :  { %2659 = vlog2.f32 %v2147_v20 }
 0x4c9   :  { %v2654_v45 = vpop.eup %2653 }
 0x4ca   :  { %v2177_v49 = vmul.f32 0.6931472, %v2654_v45  ;;  %v2153_v26 = vpop.xlane.xlu1 %2152  ;;  %v2151_v15 = vpop.xlane.xlu0 %2150 }
 0x4cb   :  { %2661 = vlog2.f32 %v2153_v26 }
 0x4cc   :  { %v2207_v60 = vsub.f32 %v4219_v46, %v2177_v49  ;;  %2663 = vlog2.f32 %v2151_v15 }
 0x4cd   :  { %v2656_v24 = vpop.eup %2655 }
 0x4ce   :  { %v2658_v27 = vpop.eup %2657  ;;  %2223 = vst [vmem:[#allocation13 + $0x8] sm:$0xff] %v2207_v60  ;;  %v2175_v8 = vmul.f32 0.6931472, %v2656_v24  ;;  %v2157_v61 = vpop.xlane.xlu1 %2156 }
 0x4cf   :  { %v2155_v53 = vpop.xlane.xlu0 %2154  ;;  %v2181_v25 = vmul.f32 0.6931472, %v2658_v27  ;;  %2665 = vlog2.f32 %v2157_v61 }
 0x4d0   :  { %v2206_v43 = vsub.f32 %v4222_v7, %v2175_v8  ;;  %2667 = vlog2.f32 %v2155_v53 }
 0x4d1   :  { %v2660_v2 = vpop.eup %2659  ;;  %v2209_v23 = vsub.f32 %v4224_v10, %v2181_v25 }
 0x4d2   :  { %2222 = vst [vmem:[#allocation13] sm:$0xff] %v2206_v43  ;;  %v2179_v35 = vmul.f32 0.6931472, %v2660_v2  ;;  %v2161_v44 = vpop.xlane.xlu1 %2160 }
 0x4d3   :  { %v2159_v19 = vpop.xlane.xlu0 %2158  ;;  %2225 = vst [vmem:[#allocation13 + $0x18] sm:$0xff] %v2209_v23  ;;  %2669 = vlog2.f32 %v2161_v44 }
 0x4d4   :  { %v2208_v46 = vsub.f32 %v4228_v29, %v2179_v35  ;;  %2671 = vlog2.f32 %v2159_v19 }
 0x4d5   :  { %v2662_v52 = vpop.eup %2661 }
 0x4d6   :  { %v2664_v14 = vpop.eup %2663  ;;  %2224 = vst [vmem:[#allocation13 + $0x10] sm:$0xff] %v2208_v46  ;;  %v2185_v38 = vmul.f32 0.6931472, %v2662_v52  ;;  %v2165_v28 = vpop.xlane.xlu1 %2164 }
 0x4d7   :  { %v2163_v47 = vpop.xlane.xlu0 %2162  ;;  %v2183_v7 = vmul.f32 0.6931472, %v2664_v14  ;;  %2673 = vlog2.f32 %v2165_v28 }
 0x4d8   :  { %v2211_v37 = vsub.f32 %v4234_v0, %v2185_v38  ;;  %2675 = vlog2.f32 %v2163_v47 }
 0x4d9   :  { %v2666_v10 = vpop.eup %2665  ;;  %v2210_v63 = vsub.f32 %v4230_v12, %v2183_v7 }
 0x4da   :  { %v2668_v56 = vpop.eup %2667  ;;  %2227 = vst [vmem:[#allocation13 + $0x28] sm:$0xff] %v2211_v37  ;;  %v2189_v16 = vmul.f32 0.6931472, %v2666_v10  ;;  %v2169_v50 = vpop.xlane.xlu1 %2168 }
 0x4db   :  { %v2167_v29 = vpop.xlane.xlu0 %2166  ;;  %2226 = vst [vmem:[#allocation13 + $0x20] sm:$0xff] %v2210_v63  ;;  %v2187_v31 = vmul.f32 0.6931472, %v2668_v56  ;;  %2677 = vlog2.f32 %v2169_v50 }
 0x4dc   :  { %v2213_v4 = vsub.f32 %v4240_v39, %v2189_v16  ;;  %2679 = vlog2.f32 %v2167_v29 }
 0x4dd   :  { %v2670_v62 = vpop.eup %2669  ;;  %v2212_v18 = vsub.f32 %v4236_v21, %v2187_v31 }
 0x4de   :  { %v2672_v33 = vpop.eup %2671  ;;  %2229 = vst [vmem:[#allocation13 + $0x38] sm:$0xff] %v2213_v4  ;;  %v2193_v0 = vmul.f32 0.6931472, %v2670_v62  ;;  %v2173_v32 = vpop.xlane.xlu1 %2172 }
 0x4df   :  { %v2171_v22 = vpop.xlane.xlu0 %2170  ;;  %2228 = vst [vmem:[#allocation13 + $0x30] sm:$0xff] %v2212_v18  ;;  %v2191_v12 = vmul.f32 0.6931472, %v2672_v33  ;;  %2681 = vlog2.f32 %v2173_v32 }
 0x4e0   :  { %v2215_v17 = vsub.f32 %v4246_v59, %v2193_v0  ;;  %2683 = vlog2.f32 %v2171_v22 }
 0x4e1   :  { %v2674_v3 = vpop.eup %2673  ;;  %v2214_v13 = vsub.f32 %v4242_v9, %v2191_v12 }
 0x4e2   :  { %v2676_v6 = vpop.eup %2675  ;;  %2231 = vst [vmem:[#allocation13 + $0x48] sm:$0xff] %v2215_v17  ;;  %v2197_v39 = vmul.f32 0.6931472, %v2674_v3 }
 0x4e3   :  { %2230 = vst [vmem:[#allocation13 + $0x40] sm:$0xff] %v2214_v13  ;;  %v2195_v11 = vmul.f32 0.6931472, %v2676_v6 }
 0x4e4   :  { %v2217_v21 = vsub.f32 %v4253_v30, %v2197_v39 }
 0x4e5   :  { %v2678_v36 = vpop.eup %2677  ;;  %v2216_v42 = vsub.f32 %v4248_v5, %v2195_v11 }
 0x4e6   :  { %v2680_v54 = vpop.eup %2679  ;;  %2233 = vst [vmem:[#allocation13 + $0x58] sm:$0xff] %v2217_v21  ;;  %v2201_v57 = vmul.f32 0.6931472, %v2678_v36 }
 0x4e7   :  { %2232 = vst [vmem:[#allocation13 + $0x50] sm:$0xff] %v2216_v42  ;;  %v2199_v51 = vmul.f32 0.6931472, %v2680_v54 }
 0x4e8   :  { %v2219_v59 = vsub.f32 %v4261_v58, %v2201_v57 }
 0x4e9   :  { %v2682_v34 = vpop.eup %2681  ;;  %v2218_v9 = vsub.f32 %v4256_v40, %v2199_v51 }
 0x4ea   :  { %v2684_v41 = vpop.eup %2683  ;;  %2235 = vst [vmem:[#allocation13 + $0x68] sm:$0xff] %v2219_v59  ;;  %v2205_v55 = vmul.f32 0.6931472, %v2682_v34 }
 0x4eb   :  { %2234 = vst [vmem:[#allocation13 + $0x60] sm:$0xff] %v2218_v9  ;;  %v2203_v30 = vmul.f32 0.6931472, %v2684_v41 }
 0x4ec   :  { %v2221_v20 = vsub.f32 %v4269_v48, %v2205_v55 }
 0x4ed   :  { %v2220_v5 = vsub.f32 %v4264_v1, %v2203_v30 }
 0x4ee   :  { %2237 = vst [vmem:[#allocation13 + $0x78] sm:$0xff] %v2221_v20 }
 0x4ef   :  { %2236 = vst [vmem:[#allocation13 + $0x70] sm:$0xff] %v2220_v5 }
 0x4f0   :  { %2853 = shalt.err (!%p2850_p10)
}
 0x4f1   :  { %s2854_s24 = scalar_lea.hbm %s4312_s9, 2048 }
 0x4f2   :  { %p2855_p11 = scmp.ne.s32.totalorder %s4312_s9, %s2854_s24  ;;  %p2858_p12 = scmp.lt.u32.totalorder %s2854_s24, %s4312_s9 }
 0x4f4   :  { %p2860_p13 = pnand %p2858_p12, %p2855_p11 }
 0x4f6   :  { %2863 = shalt.err (!%p2860_p13)
}
 0x4f7   :  { %2249 = dma.vmem_to_hbm [thread:$0]  %s2244_s25, 2048, %s4312_s9, [#allocation4], %s2875_s19, %s2875_s19, %s2876_s20  }
 0x4f8   :  { %2872 = dma.done.wait [#allocation4], 2048  }
 0x4f9   :  { %2873 = vsyncadd [#allocation4], 4294965248 }
 0x4fa   :  { %2253 = vsyncpa [#allocation3], 1 }
 0x4fb   :  { %2254 = vsyncpa [#allocation6], 1 }
 0x4fc   :  { %2255 = vsyncpa [#allocation9], 1 }
 0x4fd   :  { %2256 = vsyncpa [#allocation12], 1 }
 0x4fe   :  { %2257 = vsyncpa [#allocation4], 1 }

</bundles_post_ra>
